<compile_context>
chip_gen: v7x
topology: tpu7x:2x2x1
jax: 0.10.0
libtpu: 0.0.40
codegen_flags: <defaults>
</compile_context>

<pallas_src>
import functools

import jax
import jax.numpy as jnp
from jax import lax
from jax.experimental import pallas as pl
from jax.experimental.pallas import tpu as pltpu

_PAD = 8  # zero guard rows above/below the conv1 slab (keep all tap slices in-bounds)


# ----------------------------------------------------------------------------
# Fused ConvBlock kernel: one (batch element, row tile) per grid step
# ----------------------------------------------------------------------------
def _conv_block_kernel(*refs, H, W, TH, c, res_conv):
    if res_conv:
        (x_ref, w1_ref, b1_ref, w2_ref, b2_ref, w3_ref, b3_ref,
         wr_ref, br_ref, out_ref, x2_ref) = refs
    else:
        (x_ref, w1_ref, b1_ref, w2_ref, b2_ref, w3_ref, b3_ref,
         out_ref, x2_ref) = refs
        wr_ref = br_ref = None

    t = pl.program_id(1)
    nT = pl.num_programs(1)
    rows = TH * W                          # output pixels in this tile

    start = t * rows                       # flat offset of the tile's 1st pixel
    if rows % 8 == 0:
        start = pl.multiple_of(start, 8)

    # --- conv1: 1x1 conv == matmul (bf16 operands, f32 accum), + bias, ReLU --
    def conv1(v_f32):
        y = jnp.dot(v_f32.astype(jnp.bfloat16), w1_ref[...],
                    preferred_element_type=jnp.float32)
        return jnp.maximum(y + b1_ref[...], 0.0)

    x_c = x_ref[pl.ds(start, rows), :].astype(jnp.float32)       # (rows, cin)
    h1_c = conv1(x_c)                                             # (rows, c)

    # Halo rows: recompute conv1 on the row above / below the tile (clamped
    # reads; scaled to zero at the image border -> 'same' padding for conv2).
    top_start = jnp.maximum(start - W, 0)
    bot_start = jnp.minimum(start + rows, (H - 1) * W)
    if W % 8 == 0:
        top_start = pl.multiple_of(top_start, 8)
        bot_start = pl.multiple_of(bot_start, 8)
    h1_top = conv1(x_ref[pl.ds(top_start, W), :].astype(jnp.float32))
    h1_bot = conv1(x_ref[pl.ds(bot_start, W), :].astype(jnp.float32))
    h1_top = h1_top * (t > 0).astype(jnp.float32)                 # (W, c)
    h1_bot = h1_bot * (t < nT - 1).astype(jnp.float32)            # (W, c)

    # --- conv2: 3x3 'same' conv as 9 accumulating (rows, c)@(c, c) matmuls ---
    # Slab = [8 zero rows | h1(row r0-1) | h1(rows r0..r0+TH-1) | h1(row r0+TH)
    #         | 8 zero rows], flat over (row, col) with c lanes.  Tap (kh, kw)
    # is a contiguous static slice at offset _PAD + kh*W + (kw-1).
    zpad = jnp.zeros((_PAD, c), jnp.float32)
    slab = jnp.concatenate([zpad, h1_top, h1_c, h1_bot, zpad], axis=0)
    col = (lax.broadcasted_iota(jnp.int32, (slab.shape[0], 1), 0) - _PAD) % W
    s_mid = slab.astype(jnp.bfloat16)                                  # kw == 1
    s_lft = jnp.where(col != W - 1, slab, 0.0).astype(jnp.bfloat16)    # kw == 0
    s_rgt = jnp.where(col != 0, slab, 0.0).astype(jnp.bfloat16)        # kw == 2

    acc = jnp.zeros((rows, c), jnp.float32)
    for kh in range(3):
        for kw, src in ((0, s_lft), (1, s_mid), (2, s_rgt)):
            s0 = _PAD + kh * W + (kw - 1)
            acc = acc + jnp.dot(src[s0:s0 + rows, :], w2_ref[kh, kw],
                                preferred_element_type=jnp.float32)
    x2 = jnp.maximum(acc + b2_ref[...], 0.0)                       # (rows, c)
    x2_ref[...] = x2.astype(x2_ref.dtype)

    # --- conv3 (no act) + residual, accumulated into one f32 buffer ----------
    h3 = jnp.dot(x2.astype(jnp.bfloat16), w3_ref[...],
                 preferred_element_type=jnp.float32) + b3_ref[...]
    if res_conv:
        h3 = h3 + jnp.dot(x_c.astype(jnp.bfloat16), wr_ref[...],
                          preferred_element_type=jnp.float32) + br_ref[...]
    else:
        h3 = h3 + x_c                                   # identity (cin == cout)
    out_ref[...] = jnp.maximum(h3, 0.0).astype(out_ref.dtype)


# ----------------------------------------------------------------------------
# Wrapper (NHWC / channels-last)
# ----------------------------------------------------------------------------
def _pick_tile_rows(H, W):
    """Largest divisor of H giving <= ~2048 pixels per tile with an
    8-divisible sublane count (falls back to the whole image)."""
    target = max(1, 2048 // max(W, 1))
    cand = [d for d in range(1, H + 1)
            if H % d == 0 and ((d * W) % 8 == 0 or d == H)]
    fitting = [d for d in cand if d <= target]
    return max(fitting) if fitting else H


def _vmem_limit_bytes():
    try:
        cap = int(getattr(pltpu.get_tpu_info(), "vmem_capacity_bytes",
                          128 * 1024 * 1024))
    except Exception:
        cap = 128 * 1024 * 1024
    # ~48 MiB on v7x (64 MiB physical), ~96-100 MiB on v5e/v6e (128 MiB).
    return max(32 * 1024 * 1024, min(3 * cap // 4, 100 * 1024 * 1024))


def conv_block_nhwc(x_nhwc, p, *, res_conv, tile_rows=None):
    """ConvBlock forward, NHWC in / NHWC out.  Returns (out, x2)."""
    N, H, W, cin = x_nhwc.shape
    c = p["w1"].shape[-1]
    cout = p["w3"].shape[-1]
    if not res_conv and cin != cout:
        raise ValueError("identity shortcut needs in_channels == out_channels")

    TH = tile_rows if tile_rows is not None else _pick_tile_rows(H, W)
    if H % TH != 0 or ((TH * W) % 8 != 0 and TH != H):
        raise ValueError(f"bad tile_rows={TH} for H={H}, W={W}")
    nT = H // TH
    HW, rows = H * W, TH * W

    # Fold the inference-mode BN scale into the conv weights (bf16 MXU
    # operands); biases stay f32 for the epilogue.
    s1, b1 = p["bn1"]; s2, b2 = p["bn2"]; s3, b3 = p["bn3"]
    w1 = (p["w1"].reshape(cin, c) * s1).astype(jnp.bfloat16)
    w2 = (p["w2"] * s2).astype(jnp.bfloat16)                  # (3, 3, c, c)
    w3 = (p["w3"].reshape(c, cout) * s3).astype(jnp.bfloat16)
    b1 = b1.reshape(1, c).astype(jnp.float32)
    b2 = b2.reshape(1, c).astype(jnp.float32)
    b3 = b3.reshape(1, cout).astype(jnp.float32)

    x_flat = x_nhwc.reshape(N, HW, cin)     # layout-preserving (free) reshape

    def const_spec(shape):
        return pl.BlockSpec(shape, lambda n, t: (0,) * len(shape))

    in_specs = [pl.BlockSpec((None, HW, cin), lambda n, t: (n, 0, 0)),
                const_spec((cin, c)), const_spec((1, c)),
                const_spec((3, 3, c, c)), const_spec((1, c)),
                const_spec((c, cout)), const_spec((1, cout))]
    args = [x_flat, w1, b1, w2, b2, w3, b3]
    if res_conv:
        sr, br = p["bnr"]
        wr = (p["wr"].reshape(cin, cout) * sr).astype(jnp.bfloat16)
        br = br.reshape(1, cout).astype(jnp.float32)
        in_specs += [const_spec((cin, cout)), const_spec((1, cout))]
        args += [wr, br]

    kernel = functools.partial(_conv_block_kernel, H=H, W=W, TH=TH, c=c,
                               res_conv=res_conv)
    out_flat, x2_flat = pl.pallas_call(
        kernel,
        out_shape=(jax.ShapeDtypeStruct((N, HW, cout), x_nhwc.dtype),
                   jax.ShapeDtypeStruct((N, HW, c), x_nhwc.dtype)),
        grid=(N, nT),
        in_specs=in_specs,
        out_specs=(pl.BlockSpec((None, rows, cout), lambda n, t: (n, t, 0)),
                   pl.BlockSpec((None, rows, c), lambda n, t: (n, t, 0))),
        compiler_params=pltpu.CompilerParams(
            dimension_semantics=("parallel", "parallel"),
            vmem_limit_bytes=_vmem_limit_bytes()),
    )(*args)
    return out_flat.reshape(N, H, W, cout), x2_flat.reshape(N, H, W, c)


def conv_block(x_nchw, p, *, res_conv, return_x_2=True, tile_rows=None):
    """PyTorch-parity entry point (ConvBlock.forward): NCHW in, NCHW out."""
    x = jnp.transpose(x_nchw, (0, 2, 3, 1))
    out, x2 = conv_block_nhwc(x, p, res_conv=res_conv, tile_rows=tile_rows)
    out = jnp.transpose(out, (0, 3, 1, 2))
    if return_x_2:
        return out, jnp.transpose(x2, (0, 3, 1, 2))
    return out


# ----------------------------------------------------------------------------
# Deterministic synthetic parameters (inference-mode BN folded to scale/bias)
# ----------------------------------------------------------------------------
def _fold_bn(gamma, beta, mean, var, eps):
    scale = gamma / jnp.sqrt(var + eps)
    return scale, beta - mean * scale


def _init_bn(key, ch, eps):
    k1, k2, k3, k4 = jax.random.split(key, 4)
    gamma = 1.0 + 0.1 * jax.random.normal(k1, (ch,), jnp.float32)
    beta = 0.1 * jax.random.normal(k2, (ch,), jnp.float32)
    mean = 0.1 * jax.random.normal(k3, (ch,), jnp.float32)
    var = 0.5 + 0.1 * jnp.abs(jax.random.normal(k4, (ch,), jnp.float32))
    return _fold_bn(gamma, beta, mean, var, eps)


def _init_w(key, kh, kw, cin, cout):
    return 0.1 * jax.random.normal(key, (kh, kw, cin, cout), jnp.float32)


def make_params(key, in_channels, out_channels, *, res_conv):
    c = out_channels // 4                       # expansion = 4
    ks = jax.random.split(key, 8)
    p = {
        "w1": _init_w(ks[0], 1, 1, in_channels, c),
        "bn1": _init_bn(ks[1], c, 1e-5),                # nn.BatchNorm2d default
        "w2": _init_w(ks[2], 3, 3, c, c),
        "bn2": _init_bn(ks[3], c, 1e-5),
        "w3": _init_w(ks[4], 1, 1, c, out_channels),
        "bn3": _init_bn(ks[5], out_channels, 1e-5),
    }
    if res_conv:
        p["wr"] = _init_w(ks[6], 1, 1, in_channels, out_channels)
        p["bnr"] = _init_bn(ks[7], out_channels, 1e-6)  # norm_layer eps=1e-6
    return p


# ----------------------------------------------------------------------------
# Pure-JAX f32 reference (mirrors the PyTorch ConvBlock.forward semantics)
# ----------------------------------------------------------------------------
def _ref_conv(x, w, scale, bias, *, relu):
    y = lax.conv_general_dilated(
        x, w, window_strides=(1, 1), padding="SAME",
        dimension_numbers=("NHWC", "HWIO", "NHWC"),
        precision=lax.Precision.HIGHEST)
    y = y * scale + bias
    return jnp.maximum(y, 0.0) if relu else y


def ref_conv_block(x_nchw, p, *, res_conv):
    x = jnp.transpose(x_nchw, (0, 2, 3, 1))
    h1 = _ref_conv(x, p["w1"], *p["bn1"], relu=True)
    x2 = _ref_conv(h1, p["w2"], *p["bn2"], relu=True)
    h3 = _ref_conv(x2, p["w3"], *p["bn3"], relu=False)
    r = _ref_conv(x, p["wr"], *p["bnr"], relu=False) if res_conv else x
    out = jnp.maximum(h3 + r, 0.0)
    return (jnp.transpose(out, (0, 3, 1, 2)),
            jnp.transpose(x2, (0, 3, 1, 2)))


# ----------------------------------------------------------------------------
if __name__ == "__main__":
    key = jax.random.PRNGKey(0)
    kx1, kx2, kp1, kp2 = jax.random.split(key, 4)
    N, H, W = 2, 16, 16
    # Tolerance covers bf16 MXU operands vs. the HIGHEST-precision reference.
    TOL = dict(atol=2e-2, rtol=2e-2)

    # Config 1: projection shortcut, 16 -> 32 channels (c = 8); 4-row tiles
    # (grid (2, 4) exercises top-border, interior and bottom-border tiles).
    cin, cout = 16, 32
    x1 = jax.random.normal(kx1, (N, cin, H, W), jnp.float32)      # NCHW input
    p1 = make_params(kp1, cin, cout, res_conv=True)
    out1, x2a = conv_block(x1, p1, res_conv=True, tile_rows=4)
    out1 = jax.block_until_ready(out1)
    x2a = jax.block_until_ready(x2a)
    ro1, rx1 = ref_conv_block(x1, p1, res_conv=True)
    assert out1.shape == (N, cout, H, W), out1.shape
    assert x2a.shape == (N, cout // 4, H, W), x2a.shape
    assert bool(jnp.all(jnp.isfinite(out1)))
    assert bool(jnp.allclose(out1, ro1, **TOL)), float(jnp.max(jnp.abs(out1 - ro1)))
    assert bool(jnp.allclose(x2a, rx1, **TOL)), float(jnp.max(jnp.abs(x2a - rx1)))

    # Config 2: identity shortcut, 16 -> 16 channels (c = 4); 8-row tiles.
    cin2 = cout2 = 16
    x2in = jax.random.normal(kx2, (N, cin2, H, W), jnp.float32)
    p2 = make_params(kp2, cin2, cout2, res_conv=False)
    out2, x2b = conv_block(x2in, p2, res_conv=False, tile_rows=8)
    out2 = jax.block_until_ready(out2)
    x2b = jax.block_until_ready(x2b)
    ro2, rx2 = ref_conv_block(x2in, p2, res_conv=False)
    assert out2.shape == (N, cout2, H, W), out2.shape
    assert bool(jnp.allclose(out2, ro2, **TOL)), float(jnp.max(jnp.abs(out2 - ro2)))
    assert bool(jnp.allclose(x2b, rx2, **TOL)), float(jnp.max(jnp.abs(x2b - rx2)))

    # Auto-picked tiling (whole image in one tile at this size) — same result.
    out3, x2c = conv_block(x1, p1, res_conv=True)
    out3 = jax.block_until_ready(out3)
    x2c = jax.block_until_ready(x2c)
    assert bool(jnp.allclose(out3, ro1, **TOL)), float(jnp.max(jnp.abs(out3 - ro1)))
    assert bool(jnp.allclose(x2c, rx1, **TOL)), float(jnp.max(jnp.abs(x2c - rx1)))

    print("KERNEL_OK")
</pallas_src>

<mosaic_0001>
module attributes {stable_mosaic.version = 11 : i64} {
  func.func @_conv_block_kernel(%arg0: i32, %arg1: i32, %arg2: memref<1x256x16xf32, #tpu.memory_space<vmem>>, %arg3: memref<16x8xbf16, #tpu.memory_space<vmem>>, %arg4: memref<1x8xf32, #tpu.memory_space<vmem>>, %arg5: memref<3x3x8x8xbf16, #tpu.memory_space<vmem>>, %arg6: memref<1x8xf32, #tpu.memory_space<vmem>>, %arg7: memref<8x32xbf16, #tpu.memory_space<vmem>>, %arg8: memref<1x32xf32, #tpu.memory_space<vmem>>, %arg9: memref<16x32xbf16, #tpu.memory_space<vmem>>, %arg10: memref<1x32xf32, #tpu.memory_space<vmem>>, %arg11: memref<1x64x32xf32, #tpu.memory_space<vmem>>, %arg12: memref<1x64x8xf32, #tpu.memory_space<vmem>>) attributes {dimension_semantics = [#tpu.dimension_semantics<parallel>, #tpu.dimension_semantics<parallel>], iteration_bounds = array<i64: 2, 4>, scalar_prefetch = 0 : i64, scratch_operands = 0 : i64, tpu.core_type = #tpu.core_type<tc>, window_params = [{transform_indices = @transform_0, window_bounds = array<i64: 1, 256, 16>}, {pipeline_mode = #tpu.pipeline_mode<synchronous>, transform_indices = @transform_1, window_bounds = array<i64: 16, 8>}, {pipeline_mode = #tpu.pipeline_mode<synchronous>, transform_indices = @transform_2, window_bounds = array<i64: 1, 8>}, {pipeline_mode = #tpu.pipeline_mode<synchronous>, transform_indices = @transform_3, window_bounds = array<i64: 3, 3, 8, 8>}, {pipeline_mode = #tpu.pipeline_mode<synchronous>, transform_indices = @transform_4, window_bounds = array<i64: 1, 8>}, {pipeline_mode = #tpu.pipeline_mode<synchronous>, transform_indices = @transform_5, window_bounds = array<i64: 8, 32>}, {pipeline_mode = #tpu.pipeline_mode<synchronous>, transform_indices = @transform_6, window_bounds = array<i64: 1, 32>}, {pipeline_mode = #tpu.pipeline_mode<synchronous>, transform_indices = @transform_7, window_bounds = array<i64: 16, 32>}, {pipeline_mode = #tpu.pipeline_mode<synchronous>, transform_indices = @transform_8, window_bounds = array<i64: 1, 32>}, {transform_indices = @transform_9, window_bounds = array<i64: 1, 64, 32>}, {transform_indices = @transform_10, window_bounds = array<i64: 1, 64, 8>}]} {
    %c64_i32 = arith.constant 64 : i32
    %0 = arith.muli %arg1, %c64_i32 : i32
    %1 = tpu.assume_multiple %0, 8 : i32
    %c0 = arith.constant 0 : index
    %2 = arith.index_cast %1 : i32 to index
    %c0_0 = arith.constant 0 : index
    %3 = vector.load %arg2[%c0, %2, %c0_0] : memref<1x256x16xf32, #tpu.memory_space<vmem>>, vector<1x64x16xf32>
    %4 = vector.shape_cast %3 : vector<1x64x16xf32> to vector<64x16xf32>
    %5 = arith.truncf %4 : vector<64x16xf32> to vector<64x16xbf16>
    %c0_1 = arith.constant 0 : index
    %c0_2 = arith.constant 0 : index
    %6 = vector.load %arg3[%c0_1, %c0_2] : memref<16x8xbf16, #tpu.memory_space<vmem>>, vector<16x8xbf16>
    %cst = arith.constant dense<0.000000e+00> : vector<64x8xf32>
    %7 = tpu.matmul %5, %6, %cst {dimension_numbers = #tpu.dot_dimension_numbers<[1], [0], [0], [1], [0, 0, 1, 1], [], []>} : vector<64x16xbf16>, vector<16x8xbf16>, vector<64x8xf32> -> vector<64x8xf32>
    %c0_3 = arith.constant 0 : index
    %c0_4 = arith.constant 0 : index
    %8 = vector.load %arg4[%c0_3, %c0_4] : memref<1x8xf32, #tpu.memory_space<vmem>>, vector<1x8xf32>
    %9 = vector.broadcast %8 : vector<1x8xf32> to vector<64x8xf32>
    %10 = arith.addf %7, %9 : vector<64x8xf32>
    %cst_5 = arith.constant 0.000000e+00 : f32
    %11 = vector.broadcast %cst_5 : f32 to vector<64x8xf32>
    %12 = arith.maximumf %10, %11 : vector<64x8xf32>
    %c16_i32 = arith.constant 16 : i32
    %13 = arith.subi %1, %c16_i32 : i32
    %c0_i32 = arith.constant 0 : i32
    %14 = arith.maxsi %13, %c0_i32 : i32
    %c64_i32_6 = arith.constant 64 : i32
    %15 = arith.addi %1, %c64_i32_6 : i32
    %c240_i32 = arith.constant 240 : i32
    %16 = arith.minsi %15, %c240_i32 : i32
    %17 = tpu.assume_multiple %14, 8 : i32
    %18 = tpu.assume_multiple %16, 8 : i32
    %c0_7 = arith.constant 0 : index
    %19 = arith.index_cast %17 : i32 to index
    %c0_8 = arith.constant 0 : index
    %20 = vector.load %arg2[%c0_7, %19, %c0_8] : memref<1x256x16xf32, #tpu.memory_space<vmem>>, vector<1x16x16xf32>
    %21 = vector.shape_cast %20 : vector<1x16x16xf32> to vector<16x16xf32>
    %22 = arith.truncf %21 : vector<16x16xf32> to vector<16x16xbf16>
    %c0_9 = arith.constant 0 : index
    %c0_10 = arith.constant 0 : index
    %23 = vector.load %arg3[%c0_9, %c0_10] : memref<16x8xbf16, #tpu.memory_space<vmem>>, vector<16x8xbf16>
    %cst_11 = arith.constant dense<0.000000e+00> : vector<16x8xf32>
    %24 = tpu.matmul %22, %23, %cst_11 {dimension_numbers = #tpu.dot_dimension_numbers<[1], [0], [0], [1], [0, 0, 1, 1], [], []>} : vector<16x16xbf16>, vector<16x8xbf16>, vector<16x8xf32> -> vector<16x8xf32>
    %c0_12 = arith.constant 0 : index
    %c0_13 = arith.constant 0 : index
    %25 = vector.load %arg4[%c0_12, %c0_13] : memref<1x8xf32, #tpu.memory_space<vmem>>, vector<1x8xf32>
    %26 = vector.broadcast %25 : vector<1x8xf32> to vector<16x8xf32>
    %27 = arith.addf %24, %26 : vector<16x8xf32>
    %cst_14 = arith.constant 0.000000e+00 : f32
    %28 = vector.broadcast %cst_14 : f32 to vector<16x8xf32>
    %29 = arith.maximumf %27, %28 : vector<16x8xf32>
    %c0_15 = arith.constant 0 : index
    %30 = arith.index_cast %18 : i32 to index
    %c0_16 = arith.constant 0 : index
    %31 = vector.load %arg2[%c0_15, %30, %c0_16] : memref<1x256x16xf32, #tpu.memory_space<vmem>>, vector<1x16x16xf32>
    %32 = vector.shape_cast %31 : vector<1x16x16xf32> to vector<16x16xf32>
    %33 = arith.truncf %32 : vector<16x16xf32> to vector<16x16xbf16>
    %c0_17 = arith.constant 0 : index
    %c0_18 = arith.constant 0 : index
    %34 = vector.load %arg3[%c0_17, %c0_18] : memref<16x8xbf16, #tpu.memory_space<vmem>>, vector<16x8xbf16>
    %cst_19 = arith.constant dense<0.000000e+00> : vector<16x8xf32>
    %35 = tpu.matmul %33, %34, %cst_19 {dimension_numbers = #tpu.dot_dimension_numbers<[1], [0], [0], [1], [0, 0, 1, 1], [], []>} : vector<16x16xbf16>, vector<16x8xbf16>, vector<16x8xf32> -> vector<16x8xf32>
    %c0_20 = arith.constant 0 : index
    %c0_21 = arith.constant 0 : index
    %36 = vector.load %arg4[%c0_20, %c0_21] : memref<1x8xf32, #tpu.memory_space<vmem>>, vector<1x8xf32>
    %37 = vector.broadcast %36 : vector<1x8xf32> to vector<16x8xf32>
    %38 = arith.addf %35, %37 : vector<16x8xf32>
    %cst_22 = arith.constant 0.000000e+00 : f32
    %39 = vector.broadcast %cst_22 : f32 to vector<16x8xf32>
    %40 = arith.maximumf %38, %39 : vector<16x8xf32>
    %c0_i32_23 = arith.constant 0 : i32
    %41 = arith.cmpi sgt, %arg1, %c0_i32_23 : i32
    %42 = arith.extui %41 : i1 to i32
    %43 = arith.sitofp %42 : i32 to f32
    %44 = vector.broadcast %43 : f32 to vector<16x8xf32>
    %45 = arith.mulf %29, %44 : vector<16x8xf32>
    %c3_i32 = arith.constant 3 : i32
    %46 = arith.cmpi slt, %arg1, %c3_i32 : i32
    %47 = arith.extui %46 : i1 to i32
    %48 = arith.sitofp %47 : i32 to f32
    %49 = vector.broadcast %48 : f32 to vector<16x8xf32>
    %50 = arith.mulf %40, %49 : vector<16x8xf32>
    %cst_24 = arith.constant 0.000000e+00 : f32
    %51 = vector.broadcast %cst_24 : f32 to vector<8x8xf32>
    %52 = tpu.concatenate %51, %45, %12, %50, %51 in 0 : vector<8x8xf32>, vector<16x8xf32>, vector<64x8xf32>, vector<16x8xf32>, vector<8x8xf32> -> vector<112x8xf32>
    %53 = tpu.iota {dimensions = array<i32: 0>} : vector<112x1xi32>
    %c8_i32 = arith.constant 8 : i32
    %54 = vector.broadcast %c8_i32 : i32 to vector<112x1xi32>
    %55 = arith.subi %53, %54 : vector<112x1xi32>
    %c16_i32_25 = arith.constant 16 : i32
    %c0_i32_26 = arith.constant 0 : i32
    %56 = arith.cmpi eq, %c16_i32_25, %c0_i32_26 : i32
    %c1_i32 = arith.constant 1 : i32
    %57 = arith.select %56, %c1_i32, %c16_i32_25 : i32
    %58 = vector.broadcast %57 : i32 to vector<112x1xi32>
    %59 = arith.remsi %55, %58 : vector<112x1xi32>
    %c0_i32_27 = arith.constant 0 : i32
    %60 = vector.broadcast %c0_i32_27 : i32 to vector<112x1xi32>
    %61 = arith.cmpi ne, %59, %60 : vector<112x1xi32>
    %c0_i32_28 = arith.constant 0 : i32
    %62 = vector.broadcast %c0_i32_28 : i32 to vector<112x1xi32>
    %63 = arith.cmpi slt, %59, %62 : vector<112x1xi32>
    %c0_i32_29 = arith.constant 0 : i32
    %64 = arith.cmpi slt, %57, %c0_i32_29 : i32
    %65 = vector.broadcast %64 : i1 to vector<112x1xi1>
    %66 = vector.broadcast %65 : vector<112x1xi1> to vector<112x1xi1>
    %67 = arith.xori %63, %66 : vector<112x1xi1>
    %68 = arith.andi %67, %61 : vector<112x1xi1>
    %69 = vector.broadcast %57 : i32 to vector<112x1xi32>
    %70 = arith.addi %59, %69 : vector<112x1xi32>
    %71 = arith.select %68, %70, %59 : vector<112x1xi1>, vector<112x1xi32>
    %72 = arith.truncf %52 : vector<112x8xf32> to vector<112x8xbf16>
    %c15_i32 = arith.constant 15 : i32
    %73 = vector.broadcast %c15_i32 : i32 to vector<112x1xi32>
    %74 = arith.cmpi ne, %71, %73 : vector<112x1xi32>
    %cst_30 = arith.constant 0.000000e+00 : f32
    %75 = vector.shape_cast %74 : vector<112x1xi1> to vector<112x1xi1>
    %76 = vector.broadcast %75 : vector<112x1xi1> to vector<112x8xi1>
    %77 = vector.broadcast %cst_30 : f32 to vector<112x8xf32>
    %78 = arith.select %76, %52, %77 : vector<112x8xi1>, vector<112x8xf32>
    %79 = arith.truncf %78 : vector<112x8xf32> to vector<112x8xbf16>
    %c0_i32_31 = arith.constant 0 : i32
    %80 = vector.broadcast %c0_i32_31 : i32 to vector<112x1xi32>
    %81 = arith.cmpi ne, %71, %80 : vector<112x1xi32>
    %cst_32 = arith.constant 0.000000e+00 : f32
    %82 = vector.shape_cast %81 : vector<112x1xi1> to vector<112x1xi1>
    %83 = vector.broadcast %82 : vector<112x1xi1> to vector<112x8xi1>
    %84 = vector.broadcast %cst_32 : f32 to vector<112x8xf32>
    %85 = arith.select %83, %52, %84 : vector<112x8xi1>, vector<112x8xf32>
    %86 = arith.truncf %85 : vector<112x8xf32> to vector<112x8xbf16>
    %cst_33 = arith.constant 0.000000e+00 : f32
    %87 = vector.broadcast %cst_33 : f32 to vector<64x8xf32>
    %88 = vector.extract_strided_slice %79 {offsets = [7, 0], sizes = [64, 8], strides = [1, 1]} : vector<112x8xbf16> to vector<64x8xbf16>
    %c0_34 = arith.constant 0 : index
    %c0_35 = arith.constant 0 : index
    %c0_36 = arith.constant 0 : index
    %c0_37 = arith.constant 0 : index
    %89 = vector.load %arg5[%c0_34, %c0_35, %c0_36, %c0_37] : memref<3x3x8x8xbf16, #tpu.memory_space<vmem>>, vector<1x1x8x8xbf16>
    %90 = vector.shape_cast %89 : vector<1x1x8x8xbf16> to vector<8x8xbf16>
    %cst_38 = arith.constant dense<0.000000e+00> : vector<64x8xf32>
    %91 = tpu.matmul %88, %90, %cst_38 {dimension_numbers = #tpu.dot_dimension_numbers<[1], [0], [0], [1], [0, 0, 1, 1], [], []>} : vector<64x8xbf16>, vector<8x8xbf16>, vector<64x8xf32> -> vector<64x8xf32>
    %92 = arith.addf %87, %91 : vector<64x8xf32>
    %93 = vector.extract_strided_slice %72 {offsets = [8, 0], sizes = [64, 8], strides = [1, 1]} : vector<112x8xbf16> to vector<64x8xbf16>
    %c0_39 = arith.constant 0 : index
    %c1 = arith.constant 1 : index
    %c0_40 = arith.constant 0 : index
    %c0_41 = arith.constant 0 : index
    %94 = vector.load %arg5[%c0_39, %c1, %c0_40, %c0_41] : memref<3x3x8x8xbf16, #tpu.memory_space<vmem>>, vector<1x1x8x8xbf16>
    %95 = vector.shape_cast %94 : vector<1x1x8x8xbf16> to vector<8x8xbf16>
    %cst_42 = arith.constant dense<0.000000e+00> : vector<64x8xf32>
    %96 = tpu.matmul %93, %95, %cst_42 {dimension_numbers = #tpu.dot_dimension_numbers<[1], [0], [0], [1], [0, 0, 1, 1], [], []>} : vector<64x8xbf16>, vector<8x8xbf16>, vector<64x8xf32> -> vector<64x8xf32>
    %97 = arith.addf %92, %96 : vector<64x8xf32>
    %98 = vector.extract_strided_slice %86 {offsets = [9, 0], sizes = [64, 8], strides = [1, 1]} : vector<112x8xbf16> to vector<64x8xbf16>
    %c0_43 = arith.constant 0 : index
    %c2 = arith.constant 2 : index
    %c0_44 = arith.constant 0 : index
    %c0_45 = arith.constant 0 : index
    %99 = vector.load %arg5[%c0_43, %c2, %c0_44, %c0_45] : memref<3x3x8x8xbf16, #tpu.memory_space<vmem>>, vector<1x1x8x8xbf16>
    %100 = vector.shape_cast %99 : vector<1x1x8x8xbf16> to vector<8x8xbf16>
    %cst_46 = arith.constant dense<0.000000e+00> : vector<64x8xf32>
    %101 = tpu.matmul %98, %100, %cst_46 {dimension_numbers = #tpu.dot_dimension_numbers<[1], [0], [0], [1], [0, 0, 1, 1], [], []>} : vector<64x8xbf16>, vector<8x8xbf16>, vector<64x8xf32> -> vector<64x8xf32>
    %102 = arith.addf %97, %101 : vector<64x8xf32>
    %103 = vector.extract_strided_slice %79 {offsets = [23, 0], sizes = [64, 8], strides = [1, 1]} : vector<112x8xbf16> to vector<64x8xbf16>
    %c1_47 = arith.constant 1 : index
    %c0_48 = arith.constant 0 : index
    %c0_49 = arith.constant 0 : index
    %c0_50 = arith.constant 0 : index
    %104 = vector.load %arg5[%c1_47, %c0_48, %c0_49, %c0_50] : memref<3x3x8x8xbf16, #tpu.memory_space<vmem>>, vector<1x1x8x8xbf16>
    %105 = vector.shape_cast %104 : vector<1x1x8x8xbf16> to vector<8x8xbf16>
    %cst_51 = arith.constant dense<0.000000e+00> : vector<64x8xf32>
    %106 = tpu.matmul %103, %105, %cst_51 {dimension_numbers = #tpu.dot_dimension_numbers<[1], [0], [0], [1], [0, 0, 1, 1], [], []>} : vector<64x8xbf16>, vector<8x8xbf16>, vector<64x8xf32> -> vector<64x8xf32>
    %107 = arith.addf %102, %106 : vector<64x8xf32>
    %108 = vector.extract_strided_slice %72 {offsets = [24, 0], sizes = [64, 8], strides = [1, 1]} : vector<112x8xbf16> to vector<64x8xbf16>
    %c1_52 = arith.constant 1 : index
    %c1_53 = arith.constant 1 : index
    %c0_54 = arith.constant 0 : index
    %c0_55 = arith.constant 0 : index
    %109 = vector.load %arg5[%c1_52, %c1_53, %c0_54, %c0_55] : memref<3x3x8x8xbf16, #tpu.memory_space<vmem>>, vector<1x1x8x8xbf16>
    %110 = vector.shape_cast %109 : vector<1x1x8x8xbf16> to vector<8x8xbf16>
    %cst_56 = arith.constant dense<0.000000e+00> : vector<64x8xf32>
    %111 = tpu.matmul %108, %110, %cst_56 {dimension_numbers = #tpu.dot_dimension_numbers<[1], [0], [0], [1], [0, 0, 1, 1], [], []>} : vector<64x8xbf16>, vector<8x8xbf16>, vector<64x8xf32> -> vector<64x8xf32>
    %112 = arith.addf %107, %111 : vector<64x8xf32>
    %113 = vector.extract_strided_slice %86 {offsets = [25, 0], sizes = [64, 8], strides = [1, 1]} : vector<112x8xbf16> to vector<64x8xbf16>
    %c1_57 = arith.constant 1 : index
    %c2_58 = arith.constant 2 : index
    %c0_59 = arith.constant 0 : index
    %c0_60 = arith.constant 0 : index
    %114 = vector.load %arg5[%c1_57, %c2_58, %c0_59, %c0_60] : memref<3x3x8x8xbf16, #tpu.memory_space<vmem>>, vector<1x1x8x8xbf16>
    %115 = vector.shape_cast %114 : vector<1x1x8x8xbf16> to vector<8x8xbf16>
    %cst_61 = arith.constant dense<0.000000e+00> : vector<64x8xf32>
    %116 = tpu.matmul %113, %115, %cst_61 {dimension_numbers = #tpu.dot_dimension_numbers<[1], [0], [0], [1], [0, 0, 1, 1], [], []>} : vector<64x8xbf16>, vector<8x8xbf16>, vector<64x8xf32> -> vector<64x8xf32>
    %117 = arith.addf %112, %116 : vector<64x8xf32>
    %118 = vector.extract_strided_slice %79 {offsets = [39, 0], sizes = [64, 8], strides = [1, 1]} : vector<112x8xbf16> to vector<64x8xbf16>
    %c2_62 = arith.constant 2 : index
    %c0_63 = arith.constant 0 : index
    %c0_64 = arith.constant 0 : index
    %c0_65 = arith.constant 0 : index
    %119 = vector.load %arg5[%c2_62, %c0_63, %c0_64, %c0_65] : memref<3x3x8x8xbf16, #tpu.memory_space<vmem>>, vector<1x1x8x8xbf16>
    %120 = vector.shape_cast %119 : vector<1x1x8x8xbf16> to vector<8x8xbf16>
    %cst_66 = arith.constant dense<0.000000e+00> : vector<64x8xf32>
    %121 = tpu.matmul %118, %120, %cst_66 {dimension_numbers = #tpu.dot_dimension_numbers<[1], [0], [0], [1], [0, 0, 1, 1], [], []>} : vector<64x8xbf16>, vector<8x8xbf16>, vector<64x8xf32> -> vector<64x8xf32>
    %122 = arith.addf %117, %121 : vector<64x8xf32>
    %123 = vector.extract_strided_slice %72 {offsets = [40, 0], sizes = [64, 8], strides = [1, 1]} : vector<112x8xbf16> to vector<64x8xbf16>
    %c2_67 = arith.constant 2 : index
    %c1_68 = arith.constant 1 : index
    %c0_69 = arith.constant 0 : index
    %c0_70 = arith.constant 0 : index
    %124 = vector.load %arg5[%c2_67, %c1_68, %c0_69, %c0_70] : memref<3x3x8x8xbf16, #tpu.memory_space<vmem>>, vector<1x1x8x8xbf16>
    %125 = vector.shape_cast %124 : vector<1x1x8x8xbf16> to vector<8x8xbf16>
    %cst_71 = arith.constant dense<0.000000e+00> : vector<64x8xf32>
    %126 = tpu.matmul %123, %125, %cst_71 {dimension_numbers = #tpu.dot_dimension_numbers<[1], [0], [0], [1], [0, 0, 1, 1], [], []>} : vector<64x8xbf16>, vector<8x8xbf16>, vector<64x8xf32> -> vector<64x8xf32>
    %127 = arith.addf %122, %126 : vector<64x8xf32>
    %128 = vector.extract_strided_slice %86 {offsets = [41, 0], sizes = [64, 8], strides = [1, 1]} : vector<112x8xbf16> to vector<64x8xbf16>
    %c2_72 = arith.constant 2 : index
    %c2_73 = arith.constant 2 : index
    %c0_74 = arith.constant 0 : index
    %c0_75 = arith.constant 0 : index
    %129 = vector.load %arg5[%c2_72, %c2_73, %c0_74, %c0_75] : memref<3x3x8x8xbf16, #tpu.memory_space<vmem>>, vector<1x1x8x8xbf16>
    %130 = vector.shape_cast %129 : vector<1x1x8x8xbf16> to vector<8x8xbf16>
    %cst_76 = arith.constant dense<0.000000e+00> : vector<64x8xf32>
    %131 = tpu.matmul %128, %130, %cst_76 {dimension_numbers = #tpu.dot_dimension_numbers<[1], [0], [0], [1], [0, 0, 1, 1], [], []>} : vector<64x8xbf16>, vector<8x8xbf16>, vector<64x8xf32> -> vector<64x8xf32>
    %132 = arith.addf %127, %131 : vector<64x8xf32>
    %c0_77 = arith.constant 0 : index
    %c0_78 = arith.constant 0 : index
    %133 = vector.load %arg6[%c0_77, %c0_78] : memref<1x8xf32, #tpu.memory_space<vmem>>, vector<1x8xf32>
    %134 = vector.broadcast %133 : vector<1x8xf32> to vector<64x8xf32>
    %135 = arith.addf %132, %134 : vector<64x8xf32>
    %cst_79 = arith.constant 0.000000e+00 : f32
    %136 = vector.broadcast %cst_79 : f32 to vector<64x8xf32>
    %137 = arith.maximumf %135, %136 : vector<64x8xf32>
    %c0_80 = arith.constant 0 : index
    %c0_81 = arith.constant 0 : index
    %c0_82 = arith.constant 0 : index
    %138 = vector.load %arg12[%c0_80, %c0_81, %c0_82] : memref<1x64x8xf32, #tpu.memory_space<vmem>>, vector<1x64x8xf32>
    %139 = vector.shape_cast %138 : vector<1x64x8xf32> to vector<64x8xf32>
    %140 = vector.shape_cast %137 : vector<64x8xf32> to vector<1x64x8xf32>
    tpu.vector_store %arg12[%c0_80, %c0_81, %c0_82], %140 {strides = array<i32>} : memref<1x64x8xf32, #tpu.memory_space<vmem>>, vector<1x64x8xf32>,
    %141 = arith.truncf %137 : vector<64x8xf32> to vector<64x8xbf16>
    %c0_83 = arith.constant 0 : index
    %c0_84 = arith.constant 0 : index
    %142 = vector.load %arg7[%c0_83, %c0_84] : memref<8x32xbf16, #tpu.memory_space<vmem>>, vector<8x32xbf16>
    %cst_85 = arith.constant dense<0.000000e+00> : vector<64x32xf32>
    %143 = tpu.matmul %141, %142, %cst_85 {dimension_numbers = #tpu.dot_dimension_numbers<[1], [0], [0], [1], [0, 0, 1, 1], [], []>} : vector<64x8xbf16>, vector<8x32xbf16>, vector<64x32xf32> -> vector<64x32xf32>
    %c0_86 = arith.constant 0 : index
    %c0_87 = arith.constant 0 : index
    %144 = vector.load %arg8[%c0_86, %c0_87] : memref<1x32xf32, #tpu.memory_space<vmem>>, vector<1x32xf32>
    %145 = vector.broadcast %144 : vector<1x32xf32> to vector<64x32xf32>
    %146 = arith.addf %143, %145 : vector<64x32xf32>
    %147 = arith.truncf %4 : vector<64x16xf32> to vector<64x16xbf16>
    %c0_88 = arith.constant 0 : index
    %c0_89 = arith.constant 0 : index
    %148 = vector.load %arg9[%c0_88, %c0_89] : memref<16x32xbf16, #tpu.memory_space<vmem>>, vector<16x32xbf16>
    %cst_90 = arith.constant dense<0.000000e+00> : vector<64x32xf32>
    %149 = tpu.matmul %147, %148, %cst_90 {dimension_numbers = #tpu.dot_dimension_numbers<[1], [0], [0], [1], [0, 0, 1, 1], [], []>} : vector<64x16xbf16>, vector<16x32xbf16>, vector<64x32xf32> -> vector<64x32xf32>
    %150 = arith.addf %146, %149 : vector<64x32xf32>
    %c0_91 = arith.constant 0 : index
    %c0_92 = arith.constant 0 : index
    %151 = vector.load %arg10[%c0_91, %c0_92] : memref<1x32xf32, #tpu.memory_space<vmem>>, vector<1x32xf32>
    %152 = vector.broadcast %151 : vector<1x32xf32> to vector<64x32xf32>
    %153 = arith.addf %150, %152 : vector<64x32xf32>
    %cst_93 = arith.constant 0.000000e+00 : f32
    %154 = vector.broadcast %cst_93 : f32 to vector<64x32xf32>
    %155 = arith.maximumf %153, %154 : vector<64x32xf32>
    %c0_94 = arith.constant 0 : index
    %c0_95 = arith.constant 0 : index
    %c0_96 = arith.constant 0 : index
    %156 = vector.load %arg11[%c0_94, %c0_95, %c0_96] : memref<1x64x32xf32, #tpu.memory_space<vmem>>, vector<1x64x32xf32>
    %157 = vector.shape_cast %156 : vector<1x64x32xf32> to vector<64x32xf32>
    %158 = vector.shape_cast %155 : vector<64x32xf32> to vector<1x64x32xf32>
    tpu.vector_store %arg11[%c0_94, %c0_95, %c0_96], %158 {strides = array<i32>} : memref<1x64x32xf32, #tpu.memory_space<vmem>>, vector<1x64x32xf32>,
    return
  }
  func.func @transform_0(%arg0: i32, %arg1: i32) -> (i32, i32, i32) {
    %c0_i32 = arith.constant 0 : i32
    %c0_i32_0 = arith.constant 0 : i32
    %c0_i32_1 = arith.constant 0 : i32
    return %arg0, %c0_i32, %c0_i32_0 : i32, i32, i32
  }
  func.func @transform_1(%arg0: i32, %arg1: i32) -> (i32, i32) {
    %c0_i32 = arith.constant 0 : i32
    %c0_i32_0 = arith.constant 0 : i32
    %c0_i32_1 = arith.constant 0 : i32
    return %c0_i32, %c0_i32_0 : i32, i32
  }
  func.func @transform_2(%arg0: i32, %arg1: i32) -> (i32, i32) {
    %c0_i32 = arith.constant 0 : i32
    %c0_i32_0 = arith.constant 0 : i32
    %c0_i32_1 = arith.constant 0 : i32
    return %c0_i32, %c0_i32_0 : i32, i32
  }
  func.func @transform_3(%arg0: i32, %arg1: i32) -> (i32, i32, i32, i32) {
    %c0_i32 = arith.constant 0 : i32
    %c0_i32_0 = arith.constant 0 : i32
    %c0_i32_1 = arith.constant 0 : i32
    %c0_i32_2 = arith.constant 0 : i32
    %c0_i32_3 = arith.constant 0 : i32
    return %c0_i32, %c0_i32_0, %c0_i32_1, %c0_i32_2 : i32, i32, i32, i32
  }
  func.func @transform_4(%arg0: i32, %arg1: i32) -> (i32, i32) {
    %c0_i32 = arith.constant 0 : i32
    %c0_i32_0 = arith.constant 0 : i32
    %c0_i32_1 = arith.constant 0 : i32
    return %c0_i32, %c0_i32_0 : i32, i32
  }
  func.func @transform_5(%arg0: i32, %arg1: i32) -> (i32, i32) {
    %c0_i32 = arith.constant 0 : i32
    %c0_i32_0 = arith.constant 0 : i32
    %c0_i32_1 = arith.constant 0 : i32
    return %c0_i32, %c0_i32_0 : i32, i32
  }
  func.func @transform_6(%arg0: i32, %arg1: i32) -> (i32, i32) {
    %c0_i32 = arith.constant 0 : i32
    %c0_i32_0 = arith.constant 0 : i32
    %c0_i32_1 = arith.constant 0 : i32
    return %c0_i32, %c0_i32_0 : i32, i32
  }
  func.func @transform_7(%arg0: i32, %arg1: i32) -> (i32, i32) {
    %c0_i32 = arith.constant 0 : i32
    %c0_i32_0 = arith.constant 0 : i32
    %c0_i32_1 = arith.constant 0 : i32
    return %c0_i32, %c0_i32_0 : i32, i32
  }
  func.func @transform_8(%arg0: i32, %arg1: i32) -> (i32, i32) {
    %c0_i32 = arith.constant 0 : i32
    %c0_i32_0 = arith.constant 0 : i32
    %c0_i32_1 = arith.constant 0 : i32
    return %c0_i32, %c0_i32_0 : i32, i32
  }
  func.func @transform_9(%arg0: i32, %arg1: i32) -> (i32, i32, i32) {
    %c0_i32 = arith.constant 0 : i32
    %c0_i32_0 = arith.constant 0 : i32
    return %arg0, %arg1, %c0_i32 : i32, i32, i32
  }
  func.func @transform_10(%arg0: i32, %arg1: i32) -> (i32, i32, i32) {
    %c0_i32 = arith.constant 0 : i32
    %c0_i32_0 = arith.constant 0 : i32
    return %arg0, %arg1, %c0_i32 : i32, i32, i32
  }
}

</mosaic_0001>

<bundles_post_ra>
// kernel: tpu_custom_call.1
= control target key start
LH: loop header
LB: loop body
LE: loop exit
PB: predicated region body
PF: predicated region fallthrough
CT: control target
= control target key end

     0   :  { %s4355_s0 = inlined_call_operand.hbm [shape: f32[2,256,16], index: 0, kind: input, shape index: {}]   ;;  %s4356_s1 = inlined_call_operand.hbm [shape: bf16[16,8], index: 1, kind: input, shape index: {}]   ;;  %s4357_s2 = inlined_call_operand.hbm [shape: f32[1,8], index: 2, kind: input, shape index: {}]   ;;  %s4358_s3 = inlined_call_operand.hbm [shape: bf16[3,3,8,8], index: 3, kind: input, shape index: {}]   ;;  %s4359_s4 = inlined_call_operand.hbm [shape: f32[1,8], index: 4, kind: input, shape index: {}]   ;;  %s4360_s5 = inlined_call_operand.hbm [shape: bf16[8,32], index: 5, kind: input, shape index: {}]   ;;  %s4361_s6 = inlined_call_operand.hbm [shape: f32[1,32], index: 6, kind: input, shape index: {}]   ;;  %s4362_s7 = inlined_call_operand.hbm [shape: bf16[16,32], index: 7, kind: input, shape index: {}]   ;;  %s4363_s8 = inlined_call_operand.hbm [shape: f32[1,32], index: 8, kind: input, shape index: {}]   ;;  %s4364_s9 = inlined_call_operand.hbm [shape: f32[2,256,32], index: 9, kind: output, shape index: {0}]   ;;  %s4365_s10 = inlined_call_operand.hbm [shape: f32[2,256,8], index: 10, kind: output, shape index: {1}]  }
   0x1   :  { %4382 = sst [smem:[#allocation33_spill]] %s4355_s0 }
   0x2   :  { %4383 = sst [smem:[#allocation34_spill]] %s4356_s1 }
   0x3   :  { %4384 = sst [smem:[#allocation35_spill]] %s4357_s2 }
   0x4   :  { %4385 = sst [smem:[#allocation36_spill]] %s4358_s3 }
   0x5   :  { %4386 = sst [smem:[#allocation37_spill]] %s4364_s9 }
   0x6   :  { %4387 = sst [smem:[#allocation38_spill]] %s4365_s10 }
   0x7   :  { %16 = vsyncpa [#allocation3], 0 }
   0x8   :  { %18 = vsyncpa [#allocation3 + $0x1], 0 }
   0x9   :  { %19 = vsyncpa [#allocation6], 0 }
   0xa   :  { %20 = vsyncpa [#allocation9], 0 }
   0xb   :  { %21 = vsyncpa [#allocation12], 0 }
   0xc   :  { %22 = vsyncpa [#allocation15], 0 }
   0xd   :  { %23 = vsyncpa [#allocation4], 0 }
   0xe   :  { %25 = vsyncpa [#allocation4 + $0x1], 0 }
   0xf   :  { %26 = vsyncpa [#allocation19], 0 }
  0x10   :  { %28 = vsyncpa [#allocation19 + $0x1], 0  ;;  %s3491_s13 = smov 0   ;;  %s3493_s14 = smov 0  }
  0x11   :  { %s3495_s15 = smov 0   ;;  %s3497_s16 = smov 0  }
  0x12   :  { %s3499_s17 = smov 0   ;;  %s3501_s18 = smov 0  }
  0x13   :  { %s3503_s19 = smov 0   ;;  %s3505_s20 = smov 0  }
  0x14   :  { %s3507_s21 = smov 0   ;;  %s3509_s22 = smov 0  }
  0x15   :  { %s3511_s23 = smov 0  }
  0x16 LB: > { %4388 = sst [smem:[#allocation27_spill]] %s3375_s13  ;;  %s4366_s24 = sadd.s32 4294967295, %s3415_s23   ;;  %s3415_s23 = sphi %s3511_s23, %s34_s23   ;;  %s3411_s22 = sphi %s3509_s22, %s4464_s22   ;;  %s3407_s21 = sphi %s3507_s21, %s4463_s21   ;;  %s3403_s20 = sphi %s3505_s20, %s4462_s20   ;;  %s3399_s19 = sphi %s3503_s19, %s4461_s19   ;;  %s3395_s18 = sphi %s3501_s18, %s4460_s18   ;;  %s3391_s17 = sphi %s3499_s17, %s4459_s17   ;;  %s3387_s16 = sphi %s3497_s16, %s4458_s16   ;;  %s3383_s15 = sphi %s3495_s15, %s4457_s15   ;;  %s3379_s14 = sphi %s3493_s14, %s4453_s14   ;;  %s3375_s13 = sphi %s3491_s13, %s4456_s13  }
  0x17   : > { %4389 = sst [smem:[#allocation28_spill]] %s3379_s14  ;;  %p2399_p0 = scmp.ge.s32.totalorder %s3415_s23, 1 }
  0x18   : > { %4390 = sst [smem:[#allocation29_spill]] %s3383_s15  ;;  %p3550_p1 = scmp.eq.s32.totalorder %s4366_s24, 0 }
  0x19   : > { %4391 = sst [smem:[#allocation30_spill]] %s3399_s19  ;;  %p301_p2 = scmp.lt.s32.totalorder %s3415_s23, 9 }
  0x1a   : > { %4392 = sst [smem:[#allocation31_spill]] %s3403_s20  ;;  %s3417_s27 = smov [#allocation5]  }
  0x1b   : > { %s4393_s25 = scalar_select %p3550_p1, 1, 0 }
  0x1c   : > { %p3555_p3 = pnand %p2399_p0, %p301_p2  ;;  %s313_s28 = sshll.u32 %s3417_s27, 4  ;;  %s3559_s28 = int_to_ptr.vmem [resolvable:$true] %s313_s28 }
  0x1d   : > { %s3418_s30 = smov [#allocation8]   ;;  %s3419_s12 = smov [#allocation11]  }
  0x1e   : > { %s4394_s26 = scalar_select %p3555_p3, 1, 0 }
  0x1f   : > { %p2831_p4 = pneg %p3555_p3  ;;  %s337_s11 = sshll.u32 %s3418_s30, 4  ;;  %s3569_s11 = int_to_ptr.vmem [resolvable:$true] %s337_s11 }
  0x20   : > { %4395 = sst [smem:[#allocation32_spill]] %s4394_s26  ;;  %s3571_s24 = sshll.u32 %s3419_s12, 4  ;;  %s363_s24 = int_to_ptr.vmem [resolvable:$true] %s3571_s24 }
  0x21   : > { %p3565_p5 = pnand %p2831_p4, %p3550_p1  ;;  %s4397_s1 = sld [smem:[#allocation34_spill]] }
  0x23   : > { %p3581_p7 = pneg %p3565_p5 }
  0x27   : > { %s2991_s27 = scalar_lea.hbm %s4397_s1, 128 }
  0x28   : > { %p2992_p6 = scmp.ne.s32.totalorder %s4397_s1, %s2991_s27  ;;  %p2998_p10 = scmp.lt.u32.totalorder %s2991_s27, %s4397_s1 }
  0x2a   : > { %p2994_p8 = pnand %p3581_p7, %p2992_p6 }
  0x2c   : > { %p2995_p9 = pneg %p2994_p8 }
  0x2e   : > { %p3000_p11 = pnand %p2998_p10, %p2995_p9 }
  0x30   : > { %3003 = shalt.err (!%p3000_p11)
}
  0x31   : > { %s3004_s9 = scalar_lea.vmem %s3559_s28, 128  ;;  %p3012_p2 = scmp.lt.s32.totalorder %s3559_s28, %s3559_s28 }
  0x32   : > { %p3005_p12 = scmp.ne.s32.totalorder %s3559_s28, %s3004_s9  ;;  %p3013_p4 = scmp.lt.s32.totalorder %s3004_s9, %s3004_s9 }
  0x34   : > { %p3007_p13 = pnand %p3005_p12, %p3581_p7  ;;  %p3014_p6 = por %p3013_p4, %p3012_p2 }
  0x36   : > { %p3008_p0 = pneg %p3007_p13 }
  0x38   : > { %p3015_p8 = pnand %p3014_p6, %p3008_p0 }
  0x3a   : > { %3018 = shalt.err (!%p3015_p8)
}
  0x3b   : > { %s4377_s10 = smov 64   ;;  %s3421_s19 = smov 4  }
  0x3c   : > { %2834 = dma.hbm_to_vmem [thread:$0]  (!%p3565_p5), %s4397_s1, 128, %s3559_s28, [#allocation6], %s4377_s10, %s4377_s10, %s3421_s19  }
  0x3d   : > { %s4399_s3 = sld [smem:[#allocation36_spill]] }
  0x43   : > { %s3019_s9 = scalar_lea.hbm %s4399_s3, 576 }
  0x44   : > { %p3020_p9 = scmp.ne.s32.totalorder %s4399_s3, %s3019_s9  ;;  %p3026_p12 = scmp.lt.u32.totalorder %s3019_s9, %s4399_s3 }
  0x46   : > { %p3022_p10 = pnand %p3020_p9, %p3581_p7 }
  0x48   : > { %p3023_p11 = pneg %p3022_p10 }
  0x4a   : > { %p3028_p13 = pnand %p3026_p12, %p3023_p11 }
  0x4c   : > { %3031 = shalt.err (!%p3028_p13)
}
  0x4d   : > { %s3032_s28 = scalar_lea.vmem %s3569_s11, 576  ;;  %p3040_p6 = scmp.lt.s32.totalorder %s3569_s11, %s3569_s11 }
  0x4e   : > { %p3033_p0 = scmp.ne.s32.totalorder %s3569_s11, %s3032_s28  ;;  %p3041_p8 = scmp.lt.s32.totalorder %s3032_s28, %s3032_s28 }
  0x50   : > { %p3035_p2 = pnand %p3033_p0, %p3581_p7  ;;  %p3042_p9 = por %p3041_p8, %p3040_p6 }
  0x52   : > { %p3036_p4 = pneg %p3035_p2 }
  0x54   : > { %p3043_p10 = pnand %p3042_p9, %p3036_p4 }
  0x56   : > { %3046 = shalt.err (!%p3043_p10)
}
  0x57   : > { %2840 = dma.hbm_to_vmem [thread:$0]  (!%p3565_p5), %s4399_s3, 576, %s3569_s11, [#allocation9], %s4377_s10, %s4377_s10, %s3421_s19  }
  0x58   : > { %s3047_s20 = scalar_lea.hbm %s4360_s5, 64 }
  0x59   : > { %p3048_p11 = scmp.ne.s32.totalorder %s4360_s5, %s3047_s20  ;;  %p3054_p0 = scmp.lt.u32.totalorder %s3047_s20, %s4360_s5 }
  0x5b   : > { %p3050_p12 = pnand %p3048_p11, %p3581_p7 }
  0x5d   : > { %p3051_p13 = pneg %p3050_p12 }
  0x5f   : > { %p3056_p2 = pnand %p3054_p0, %p3051_p13 }
  0x61   : > { %3059 = shalt.err (!%p3056_p2)
}
  0x62   : > { %s3060_s28 = scalar_lea.vmem %s363_s24, 64  ;;  %p3068_p9 = scmp.lt.s32.totalorder %s363_s24, %s363_s24 }
  0x63   : > { %p3061_p4 = scmp.ne.s32.totalorder %s363_s24, %s3060_s28  ;;  %p3069_p10 = scmp.lt.s32.totalorder %s3060_s28, %s3060_s28 }
  0x65   : > { %p3063_p6 = pnand %p3061_p4, %p3581_p7  ;;  %p3070_p3 = por %p3069_p10, %p3068_p9 }
  0x67   : > { %p3064_p8 = pneg %p3063_p6 }
  0x69   : > { %p3071_p1 = pnand %p3070_p3, %p3064_p8 }
  0x6b   : > { %3074 = shalt.err (!%p3071_p1)
}
  0x6c   : > { %2846 = dma.hbm_to_vmem [thread:$0]  (!%p3565_p5), %s4360_s5, 64, %s363_s24, [#allocation12]  }
  0x6d   : > { %s3422_s13 = smov [#allocation14]   ;;  %s3423_s15 = smov [#allocation7]  }
  0x6e   : > { %s383_s14 = sshll.u32 %s3422_s13, 4  ;;  %s327_s20 = sshll.u32 %s3423_s15, 4  ;;  %s384_s14 = int_to_ptr.vmem [resolvable:$true] %s383_s14  ;;  %s328_s20 = int_to_ptr.vmem [resolvable:$true] %s327_s20 }
  0x6f   : > { %s3075_s12 = scalar_lea.hbm %s4362_s7, 128 }
  0x70   : > { %p3076_p1 = scmp.ne.s32.totalorder %s4362_s7, %s3075_s12  ;;  %p3082_p12 = scmp.lt.u32.totalorder %s3075_s12, %s4362_s7 }
  0x72   : > { %p3078_p3 = pnand %p3076_p1, %p3581_p7 }
  0x74   : > { %p3079_p11 = pneg %p3078_p3 }
  0x76   : > { %p3084_p13 = pnand %p3082_p12, %p3079_p11 }
  0x78   : > { %3087 = shalt.err (!%p3084_p13)
}
  0x79   : > { %s3088_s24 = scalar_lea.vmem %s384_s14, 128  ;;  %p3096_p6 = scmp.lt.s32.totalorder %s384_s14, %s384_s14 }
  0x7a   : > { %p3089_p0 = scmp.ne.s32.totalorder %s384_s14, %s3088_s24  ;;  %p3097_p8 = scmp.lt.s32.totalorder %s3088_s24, %s3088_s24 }
  0x7c   : > { %p3091_p2 = pnand %p3089_p0, %p3581_p7  ;;  %p3098_p9 = por %p3097_p8, %p3096_p6 }
  0x7e   : > { %p3092_p4 = pneg %p3091_p2 }
  0x80   : > { %p3099_p10 = pnand %p3098_p9, %p3092_p4 }
  0x82   : > { %3102 = shalt.err (!%p3099_p10)
}
  0x83   : > { %s4400_s0 = smov 64   ;;  %s4401_s2 = sld [smem:[#allocation35_spill]] }
  0x84   : > { %2852 = dma.hbm_to_vmem [thread:$0]  (!%p3565_p5), %s4362_s7, 128, %s384_s14, [#allocation15], %s4400_s0, %s4400_s0, %s3421_s19  }
  0x89   : > { %s3103_s30 = scalar_lea.hbm %s4401_s2, 16 }
  0x8a   : > { %p3104_p1 = scmp.ne.s32.totalorder %s4401_s2, %s3103_s30  ;;  %p3110_p12 = scmp.lt.u32.totalorder %s3103_s30, %s4401_s2 }
  0x8c   : > { %p3106_p3 = pnand %p3104_p1, %p3581_p7 }
  0x8e   : > { %p3107_p11 = pneg %p3106_p3 }
  0x90   : > { %p3112_p13 = pnand %p3110_p12, %p3107_p11 }
  0x92   : > { %3115 = shalt.err (!%p3112_p13)
}
  0x93   : > { %s3116_s24 = scalar_lea.vmem %s328_s20, 16  ;;  %s3123_s19 = scalar_lea.vmem %s328_s20, 32 }
  0x94   : > { %p3117_p0 = scmp.ne.s32.totalorder %s328_s20, %s3116_s24  ;;  %p3124_p6 = scmp.lt.s32.totalorder %s328_s20, %s328_s20 }
  0x95   : > { %p3125_p8 = scmp.lt.s32.totalorder %s3123_s19, %s3116_s24 }
  0x96   : > { %p3119_p2 = pnand %p3117_p0, %p3581_p7 }
  0x97   : > { %p3126_p9 = por %p3125_p8, %p3124_p6 }
  0x98   : > { %p3120_p4 = pneg %p3119_p2 }
  0x9a   : > { %p3127_p10 = pnand %p3126_p9, %p3120_p4 }
  0x9c   : > { %3130 = shalt.err (!%p3127_p10)
}
  0x9d   : > { %2837 = dma.hbm_to_vmem [thread:$0]  (!%p3565_p5), %s4401_s2, 16, %s328_s20, [#allocation6]  }
  0x9e   : > { %s3424_s10 = smov [#allocation10]   ;;  %s3425_s15 = smov [#allocation13]  }
  0x9f   : > { %s351_s13 = sshll.u32 %s3424_s10, 4  ;;  %s373_s27 = sshll.u32 %s3425_s15, 4  ;;  %s352_s13 = int_to_ptr.vmem [resolvable:$true] %s351_s13  ;;  %s374_s27 = int_to_ptr.vmem [resolvable:$true] %s373_s27 }
  0xa0   : > { %s3131_s9 = scalar_lea.hbm %s4359_s4, 16 }
  0xa1   : > { %p3132_p1 = scmp.ne.s32.totalorder %s4359_s4, %s3131_s9  ;;  %p3138_p12 = scmp.lt.u32.totalorder %s3131_s9, %s4359_s4 }
  0xa3   : > { %p3134_p3 = pnand %p3132_p1, %p3581_p7 }
  0xa5   : > { %p3135_p11 = pneg %p3134_p3 }
  0xa7   : > { %p3140_p13 = pnand %p3138_p12, %p3135_p11 }
  0xa9   : > { %3143 = shalt.err (!%p3140_p13)
}
  0xaa   : > { %s3144_s20 = scalar_lea.vmem %s352_s13, 16  ;;  %s3151_s14 = scalar_lea.vmem %s352_s13, 32 }
  0xab   : > { %p3145_p0 = scmp.ne.s32.totalorder %s352_s13, %s3144_s20  ;;  %p3152_p6 = scmp.lt.s32.totalorder %s352_s13, %s352_s13 }
  0xac   : > { %p3153_p8 = scmp.lt.s32.totalorder %s3151_s14, %s3144_s20 }
  0xad   : > { %p3147_p2 = pnand %p3145_p0, %p3581_p7 }
  0xae   : > { %p3154_p9 = por %p3153_p8, %p3152_p6 }
  0xaf   : > { %p3148_p4 = pneg %p3147_p2 }
  0xb1   : > { %p3155_p10 = pnand %p3154_p9, %p3148_p4 }
  0xb3   : > { %3158 = shalt.err (!%p3155_p10)
}
  0xb4   : > { %2843 = dma.hbm_to_vmem [thread:$0]  (!%p3565_p5), %s4359_s4, 16, %s352_s13, [#allocation9]  }
  0xb5   : > { %s3159_s12 = scalar_lea.hbm %s4361_s6, 16 }
  0xb6   : > { %p3160_p1 = scmp.ne.s32.totalorder %s4361_s6, %s3159_s12  ;;  %p3166_p12 = scmp.lt.u32.totalorder %s3159_s12, %s4361_s6 }
  0xb8   : > { %p3162_p3 = pnand %p3160_p1, %p3581_p7 }
  0xba   : > { %p3163_p11 = pneg %p3162_p3 }
  0xbc   : > { %p3168_p13 = pnand %p3166_p12, %p3163_p11 }
  0xbe   : > { %3171 = shalt.err (!%p3168_p13)
}
  0xbf   : > { %s3172_s19 = scalar_lea.vmem %s374_s27, 16  ;;  %s3179_s13 = scalar_lea.vmem %s374_s27, 32 }
  0xc0   : > { %p3173_p0 = scmp.ne.s32.totalorder %s374_s27, %s3172_s19  ;;  %p3180_p6 = scmp.lt.s32.totalorder %s374_s27, %s374_s27 }
  0xc1   : > { %p3181_p8 = scmp.lt.s32.totalorder %s3179_s13, %s3172_s19 }
  0xc2   : > { %p3175_p2 = pnand %p3173_p0, %p3581_p7 }
  0xc3   : > { %p3182_p9 = por %p3181_p8, %p3180_p6 }
  0xc4   : > { %p3176_p4 = pneg %p3175_p2 }
  0xc6   : > { %p3183_p10 = pnand %p3182_p9, %p3176_p4 }
  0xc8   : > { %3186 = shalt.err (!%p3183_p10)
}
  0xc9   : > { %2849 = dma.hbm_to_vmem [thread:$0]  (!%p3565_p5), %s4361_s6, 16, %s374_s27, [#allocation12]  }
  0xca   : > { %s3426_s0 = smov [#allocation16]   ;;  %s3187_s12 = scalar_lea.hbm %s4363_s8, 16 }
  0xcb   : > { %s397_s10 = sshll.u32 %s3426_s0, 4  ;;  %p3188_p1 = scmp.ne.s32.totalorder %s4363_s8, %s3187_s12  ;;  %s398_s10 = int_to_ptr.vmem [resolvable:$true] %s397_s10 }
  0xcc   : > { %p3194_p12 = scmp.lt.u32.totalorder %s3187_s12, %s4363_s8 }
  0xcd   : > { %p3190_p3 = pnand %p3188_p1, %p3581_p7 }
  0xcf   : > { %p3191_p11 = pneg %p3190_p3 }
  0xd1   : > { %p3196_p13 = pnand %p3194_p12, %p3191_p11 }
  0xd3   : > { %3199 = shalt.err (!%p3196_p13)
}
  0xd4   : > { %s3200_s27 = scalar_lea.vmem %s398_s10, 16  ;;  %s3207_s19 = scalar_lea.vmem %s398_s10, 32 }
  0xd5   : > { %p3201_p0 = scmp.ne.s32.totalorder %s398_s10, %s3200_s27  ;;  %p3208_p6 = scmp.lt.s32.totalorder %s398_s10, %s398_s10 }
  0xd6   : > { %p3209_p8 = scmp.lt.s32.totalorder %s3207_s19, %s3200_s27 }
  0xd7   : > { %p3203_p2 = pnand %p3201_p0, %p3581_p7 }
  0xd8   : > { %p3210_p9 = por %p3209_p8, %p3208_p6 }
  0xd9   : > { %p3204_p4 = pneg %p3203_p2 }
  0xdb   : > { %p3211_p10 = pnand %p3210_p9, %p3204_p4 }
  0xdd   : > { %3214 = shalt.err (!%p3211_p10)
}
  0xde   : > { %2855 = dma.hbm_to_vmem [thread:$0]  (!%p3565_p5), %s4363_s8, 16, %s398_s10, [#allocation15]  }
  0xdf   : > { %s4402_s26 = sld [smem:[#allocation29_spill]]  ;;  %s2398_s14 = sadd.s32 4294967294, %s3415_s23  }
  0xe0   : > { %s4403_s0 = sld [smem:[#allocation28_spill]]  ;;  %s43_s29 = sadd.s32 1, %s3407_s21 }
  0xe1   : > { %p44_p7 = scmp.ge.s32.totalorder %s43_s29, 4  ;;  %s46_s15 = sadd.s32 1, %s3411_s22 }
  0xe2   : > { %s53_s30 = sadd.s32 1, %s3395_s18  ;;  %p60_p1 = scmp.ne.s32.totalorder %s3395_s18, %s3391_s17 }
  0xe3   : > { %s4466_s29 = smov (%p44_p7, %s43_s29), 0  ;;  %s4468_s15 = smov (!%p44_p7, %s46_s15), %s3411_s22 }
  0xe4   : > { %p61_p3 = scmp.eq.s32.totalorder %s3415_s23, 0  ;;  %p66_p11 = scmp.ne.s32.totalorder %s3391_s17, %s3387_s16 }
  0xe5   : > { %s4404_s10 = sld [smem:[#allocation27_spill]]  ;;  %p48_p5 = scmp.ge.s32.totalorder %s4468_s15, 2 }
  0xe6   : > { %s245_s12 = ssub.s32 %s3407_s21, %s4466_s29  ;;  %p3757_p12 = por %p61_p3, %p60_p1 }
  0xe7   : > { %p4406_p13 = scmp.ne.s32.totalorder %s4393_s25, 0  ;;  %s4470_s15 = smov (%p48_p5, %s4468_s15), 0 }
  0xe8   : > { %s249_s11 = sadd.s32 1, %s4402_s26  ;;  %p259_p2 = scmp.ne.s32.totalorder %s4402_s26, %s4403_s0 }
  0xe9   : > { %p3763_p0 = por %p4406_p13, %p66_p11  ;;  %s50_s16 = ssub.s32 %s3411_s22, %s4470_s15 }
  0xea   : > { %s4408_s24 = sadd.s32 4294967295, %s3415_s23   ;;  %p51_p6 = scmp.eq.s32.totalorder %s50_s16, 0 }
  0xeb   : > { %p260_p4 = scmp.eq.s32.totalorder %s4408_s24, 7  ;;  %s246_s27 = sor.u32 %s245_s12, %s50_s16 }
  0xec   : > { %p247_p8 = scmp.eq.s32.totalorder %s246_s27, 0  ;;  %p265_p10 = scmp.ne.s32.totalorder %s4403_s0, %s4404_s10 }
  0xed   : > { %p3776_p9 = por %p260_p4, %p259_p2  ;;  %p266_p7 = scmp.eq.s32.totalorder %s2398_s14, 7 }
  0xee   : > { %s3781_s13 = scalar_select %p51_p6, %s3395_s18, %s53_s30  }
  0xef   : > { %s4409_s19 = scalar_select %p3776_p9, 1, 0 }
  0xf0   : > { %s4472_s26 = smov (!%p247_p8, %s4402_s26), %s249_s11  ;;  %p2875_p1 = scmp.lt.s32.totalorder %s3415_s23, 8 }
  0xf1   : > { %s408_s20 = sand.u32 1, %s3395_s18   ;;  %p3790_p3 = por %p266_p7, %p265_p10 }
  0xf2   : > { %s2409_s24 = sshll.u32 %s408_s20, 8  ;;  %s2503_s2 = sshll.u32 %s3411_s22, 12 }
  0xf3   : > { %s4410_s1 = scalar_select %p3790_p3, 1, 0 }
  0xf4   : > { %s4411_s27 = sld [smem:[#allocation33_spill]]  ;;  %s412_s30 = scalar_lea.vmem [#allocation2], %s2409_s24 }
  0xf5   : > { %s419_s0 = sshll.u32 %s412_s30, 4  ;;  %p3802_p11 = pnand %p2875_p1, %p3757_p12  ;;  %s3806_s0 = int_to_ptr.vmem [resolvable:$true] %s419_s0 }
  0xf6   : > { %s3808_s10 = scalar_lea.sflag [#allocation3], %s408_s20 }
  0xf7   : > { %p3217_p13 = pneg %p3802_p11 }
  0xfa   : > { %s3798_s3 = scalar_lea.hbm %s4411_s27, %s2503_s2  ;;  %s3220_s24 = scalar_lea.hbm %s4411_s27, 8192 }
  0xfb   : > { %s3215_s11 = scalar_lea.hbm %s3798_s3, 4096  ;;  %p3221_p12 = scmp.lt.u32.totalorder %s3798_s3, %s4411_s27 }
  0xfc   : > { %p3216_p5 = scmp.ne.s32.totalorder %s3798_s3, %s3215_s11  ;;  %p3222_p6 = scmp.lt.u32.totalorder %s3220_s24, %s3215_s11 }
  0xfd   : > { %p3224_p10 = scmp.lt.u32.totalorder %s3215_s11, %s3798_s3 }
  0xfe   : > { %p3218_p2 = pnand %p3217_p13, %p3216_p5  ;;  %p3223_p8 = por %p3222_p6, %p3221_p12 }
 0x100   : > { %p3219_p4 = pneg %p3218_p2  ;;  %p3225_p7 = por %p3224_p10, %p3223_p8 }
 0x102   : > { %p3226_p1 = pnand %p3225_p7, %p3219_p4 }
 0x104   : > { %3229 = shalt.err (!%p3226_p1)
}
 0x105   : > { %s3230_s20 = scalar_lea.vmem %s3806_s0, 4096  ;;  %s3427_s30 = smov [#allocation2]  }
 0x106   : > { %p3231_p5 = scmp.ne.s32.totalorder %s3806_s0, %s3230_s20  ;;  %s3235_s2 = sshll.u32 %s3427_s30, 4  ;;  %s3236_s2 = int_to_ptr.vmem [resolvable:$false] %s3235_s2 }
 0x107   : > { %s3237_s9 = scalar_lea.vmem %s3236_s2, 8192  ;;  %p3238_p9 = scmp.lt.s32.totalorder %s3806_s0, %s3236_s2 }
 0x108   : > { %p3233_p2 = pnand %p3231_p5, %p3217_p13  ;;  %p3239_p12 = scmp.lt.s32.totalorder %s3237_s9, %s3230_s20 }
 0x10a   : > { %p3234_p3 = pneg %p3233_p2  ;;  %p3240_p6 = por %p3239_p12, %p3238_p9 }
 0x10c   : > { %p3241_p8 = pnand %p3240_p6, %p3234_p3 }
 0x10e   : > { %3244 = shalt.err (!%p3241_p8)
}
 0x10f   : > { %s3428_s11 = smov 128   ;;  %s3429_s24 = smov 8  }
 0x110   : > { %2859 = dma.hbm_to_vmem [thread:$0]  (!%p3802_p11), %s3798_s3, 4096, %s3806_s0, %s3808_s10, %s3428_s11, %s3428_s11, %s3429_s24  }
 0x111   : > { %s4413_s12 = sld [smem:[#allocation32_spill]] }
 0x117   : > { %p4414_p13 = scmp.ne.s32.totalorder %s4413_s12, 0 }
 0x118   : > { %s433_s16 = sand.u32 (!%p4414_p13), 1, %s3391_s17  }
 0x119   : > { %431 = sbr.rel (%p4414_p13) target bundleno = 1136 (0x470), region = 56  ;;  %s2413_s30 = sshll.u32 (!%p4414_p13), %s433_s16, 8 }
 0x11a   : > { %s434_s2 = scalar_lea.sflag (!%p4414_p13), [#allocation3], %s433_s16  ;;  %s3839_s20 = scalar_lea.vmem (!%p4414_p13), [#allocation2], %s2413_s30 }
 0x120   : > { %3346 = dma.done.wait (%p3763_p0), %s434_s2, 4096  }
 0x121   : > { %3348 = vsyncadd (%p3763_p0), %s434_s2, 4294963200  ;;  %p4415_p9 = scmp.ne.s32.totalorder %s4393_s25, 0 }
 0x123   : > { %3350 = dma.done.wait (%p4415_p9), [#allocation6], 144  }
 0x124   : > { %3352 = vsyncadd (%p4415_p9), [#allocation6], 4294967152 }
 0x125   : > { %3354 = dma.done.wait (%p4415_p9), [#allocation9], 592  }
 0x126   : > { %3356 = vsyncadd (%p4415_p9), [#allocation9], 4294966704 }
 0x127   : > { %3358 = dma.done.wait (%p4415_p9), [#allocation12], 80  }
 0x128   : > { %3360 = vsyncadd (%p4415_p9), [#allocation12], 4294967216 }
 0x129   : > { %3362 = dma.done.wait (%p4415_p9), [#allocation15], 144  }
 0x12a   : > { %3364 = vsyncadd (%p4415_p9), [#allocation15], 4294967152  ;;  %s4416_s3 = sld [smem:[#allocation30_spill]]  ;;  %v2989_v0 = vld [vmem:[#allocation5] sm:$0xff]   ;;  %vm543_vm0 = vcmask 130048   ;;  %v3430_v10 = vmov 0.0   ;;  %v747_v26 = vlaneseq }
 0x12b   : > { %2568 = vmatprep.subr.bf16.mxu1 %v2989_v0  ;;  %vm3431_vm1 = vmmov 0   ;;  %v1034_v20 = vld [vmem:[#allocation8 + $0x4] sm:$0xf]  ;;  %vm1040_vm2 = vcmask 1043456   ;;  %v3894_v22 = vld [vmem:[#allocation8 + $0x8] sm:$0xf] }
 0x12c   : > { %2569 = vmatpush3.bf16.msra.mxu1 %v2989_v0  ;;  %v1065_v21 = vsel %vm1040_vm2, %v1034_v20, 0  ;;  %2784 = vmatprep.subr.msk.bf16.mxu0 %vm1040_vm2, %v3894_v22  ;;  %v3900_v23 = vsel %vm1040_vm2, %v3894_v22, 0  ;;  %v3903_v24 = vld [vmem:[#allocation8 + $0xc] sm:$0xf]  ;;  %v3907_v25 = vld [vmem:[#allocation8] sm:$0xf] }
 0x12d   : > { %2578 = vmatprep.subr.bf16.mxu1 %v3430_v10  ;;  %2611 = vmatpush3.bf16.msra.mxu0 %v3900_v23  ;;  %v3911_v27 = vshrl.u32 %v747_v26, 7  ;;  %v3922_v38 = vld [vmem:[#allocation7] ss:$0 sm:$0xff]  ;;  %vm1132_vm9 = vsmask.f32 4352  ;;  %s4441_s30 = sld [smem:[#allocation28_spill]] }
 0x12e   : > { %2786 = vmatprep.subr.msk.bf16.mxu0 %vm1040_vm2, %v3903_v24  ;;  %vm1259_vm11 = vsmask.f32 3328  ;;  %p4444_p7 = scmp.ne.s32.totalorder %s4409_s19, 0 }
 0x12f   : > { %v752_v28 = vadd.s32 40, %v3911_v27  ;;  %v753_v29 = vadd.s32 48, %v3911_v27  ;;  %v751_v30 = vadd.s32 32, %v3911_v27  ;;  %v756_v31 = vadd.s32 72, %v3911_v27 }
 0x130   : > { %s3862_s28 = sshll.u32 %s4416_s3, 6  ;;  %v754_v32 = vadd.s32 56, %v3911_v27  ;;  %v750_v34 = vadd.s32 24, %v3911_v27  ;;  %v755_v35 = vadd.s32 64, %v3911_v27  ;;  %p735_p11 = scmp.gt.s32.totalorder %s4416_s3, 0  ;;  %v757_v41 = vadd.s32 80, %v3911_v27 }
 0x131   : > { %s515_s0 = scalar_lea.vmem %s3839_s20, %s3862_s28 [#allocation2]  ;;  %s2431_s14 = sadd.s32 4294967280, %s3862_s28  ;;  %v2437_v33 = vadd.s32 4294967288, %v752_v28  ;;  %v2438_v36 = vadd.s32 4294967288, %v753_v29  ;;  %v2436_v37 = vadd.s32 4294967288, %v751_v30  ;;  %v2441_v39 = vadd.s32 4294967288, %v756_v31 }
 0x132   : > { %v516_v1 = vld [vmem:[%s515_s0] sm:$0xff]  ;;  %v517_v2 = vld [vmem:[%s515_s0 + $0x8] sm:$0xff]  ;;  %v518_v3 = vld [vmem:[%s515_s0 + $0x10] sm:$0xff]  ;;  %p630_p0 = scmp.gt.s32.totalorder %s2431_s14, 0  ;;  %s632_s25 = sadd.s32 64, %s3862_s28  ;;  %v2439_v40 = vadd.s32 4294967288, %v754_v32 }
 0x133   : > { %v3867_v4 = vpack.c.bf16 %v517_v2, %v516_v1  ;;  %v519_v5 = vld [vmem:[%s515_s0 + $0x18] sm:$0xff]  ;;  %v520_v6 = vld [vmem:[%s515_s0 + $0x20] sm:$0xff]  ;;  %v521_v7 = vld [vmem:[%s515_s0 + $0x28] sm:$0xff]  ;;  %p633_p3 = scmp.lt.s32.totalorder %s632_s25, 240  ;;  %p741_p4 = scmp.lt.s32.totalorder %s4416_s3, 3  ;;  %v803_v42 = vand.u32 15, %v2437_v33 }
 0x134   : > { %v3869_v8 = vpack.c.bf16 %v519_v5, %v518_v3  ;;  %v3871_v9 = vpack.c.bf16 %v521_v7, %v520_v6  ;;  %v522_v11 = vld [vmem:[%s515_s0 + $0x30] sm:$0xff]  ;;  %v523_v12 = vld [vmem:[%s515_s0 + $0x38] sm:$0xff]  ;;  %s4474_s14 = smov (!%p630_p0, %s2431_s14), 0  ;;  %v3925_v43 = vadd.s32 4294967288, %v750_v34  ;;  %v2440_v44 = vadd.s32 4294967288, %v755_v35  ;;  %s4195_s2 = sand.u32 1, %s4441_s30  }
 0x135   : > { %2570 = vmatprep.mubr.msk.bf16.mxu1 %vm543_vm0, %v3867_v4  ;;  %v3882_v13 = vpack.c.bf16 %v523_v12, %v522_v11  ;;  %s635_s10 = scalar_lea.vmem %s3839_s20, %s4474_s14 [#allocation2]  ;;  %s4476_s25 = smov (!%p633_p3, %s632_s25), 240  ;;  %v749_v45 = vadd.s32 16, %v3911_v27  ;;  %v758_v46 = vadd.s32 88, %v3911_v27  ;;  %v810_v48 = vand.u32 15, %v2438_v36 }
 0x136   : > { %2571 = vmatmul.mubr.msk.bf16.vlgmr.msra.gmra.mrb[0].mxu1 %vm543_vm0, %v3869_v8  ;;  %v636_v14 = vld [vmem:[%s635_s10] sm:$0xff]  ;;  %v637_v15 = vld [vmem:[%s635_s10 + $0x8] sm:$0xff]  ;;  %s685_s9 = scalar_lea.vmem %s3839_s20, %s4476_s25 [#allocation2]  ;;  %v796_v49 = vand.u32 15, %v2436_v37  ;;  %v759_v50 = vadd.s32 96, %v3911_v27  ;;  %v831_v53 = vand.u32 15, %v2441_v39  ;;  %v817_v54 = vand.u32 15, %v2439_v40 }
 0x137   : > { %2579 = vmatpush3.bf16.msra.mxu1 %v2989_v0  ;;  %2574 = vmatprep.mubr.msk.bf16.mxu1 %vm543_vm0, %v3871_v9  ;;  %v638_v16 = vpack.c.bf16 %v637_v15, %v636_v14  ;;  %v686_v17 = vld [vmem:[%s685_s9] sm:$0xff]  ;;  %v687_v18 = vld [vmem:[%s685_s9 + $0x8] sm:$0xff]  ;;  %s3927_s11 = scalar_select %p735_p11, 1, 0  ;;  %v3935_v55 = vadd.s32 4294967288, %v757_v41  ;;  %vm3937_vm3 = vcmp.ne.s32.totalorder %v803_v42, 0 }
 0x138   : > { %2584 = vmatprep.subr.bf16.mxu1 %v3430_v10  ;;  %v688_v19 = vpack.c.bf16 %v687_v18, %v686_v17  ;;  %s3930_s24 = scalar_select %p741_p4, 1, 0  ;;  %v789_v57 = vand.u32 15, %v3925_v43  ;;  %v824_v59 = vand.u32 15, %v2440_v44  ;;  %v3944_v63 = vadd.s32 4294967288, %v749_v45 }
 0x139   : > { %s737_s12 = scvt.s32.f32 %s3927_s11  ;;  %vm3949_vm4 = vcmp.ne.s32.totalorder %v810_v48, 15  ;;  %vm3954_vm5 = vcmp.ne.s32.totalorder %v796_v49, 15  ;;  %v3958_v5 = vadd.s32 4294967288, %v759_v50  ;;  %vm3961_vm6 = vcmp.ne.s32.totalorder %v831_v53, 0  ;;  %s4379_s20 = sshll.u32 %s4195_s2, 6 }
 0x13a   : > { %s743_s16 = scvt.s32.f32 %s3930_s24  ;;  %vm3965_vm7 = vcmp.ne.s32.totalorder %v817_v54, 0  ;;  %v838_v12 = vand.u32 15, %v3935_v55  ;;  %vm3970_vm8 = vcmp.ne.s32.totalorder %v824_v59, 15  ;;  %v775_v18 = vand.u32 15, %v3911_v27  ;;  %s4200_s28 = scalar_lea.vmem [#allocation18], %s4379_s20 }
 0x13b   : > { %v3974_v17 = vstv %s737_s12  ;;  %v852_v32 = vand.u32 15, %v3958_v5  ;;  %v3991_v36 = vsel %vm1040_vm2, %v3903_v24, 0  ;;  %vm3998_vm10 = vcmp.ne.s32.totalorder %v789_v57, 0  ;;  %s4442_s0 = sld [smem:[#allocation31_spill]]  ;;  %s2495_s14 = sshll.u32 %s4416_s3, 3 }
 0x13c   : > { %vm4010_vm12 = vcmp.ne.s32.totalorder %v838_v12, 15  ;;  %vm4014_vm13 = vcmp.ne.s32.totalorder %v775_v18, 0  ;;  %s4443_s12 = sld [smem:[#allocation38_spill]]  ;;  %s2195_s30 = sshll.u32 %s4200_s28, 4  ;;  %s4243_s30 = int_to_ptr.vmem [resolvable:$true] %s2195_s30 }
 0x13d   : > { %s2162_s20 = scalar_lea.sflag [#allocation19], %s4195_s2  ;;  %s3245_s3 = scalar_lea.vmem %s4243_s30, 1024 }
 0x13e   : > { %2575 = vmatmul.mubr.msk.bf16.gmra.mrb[4].mxu1 %vm543_vm0, %v3882_v13  ;;  %p3246_p10 = scmp.ne.s32.totalorder %s4243_s30, %s3245_s3 }
 0x13f   : > { %2580 = vmatprep.mubr.msk.bf16.mxu1 %vm3431_vm1, %v3430_v10 }
 0x140   : > { %p3247_p1 = pnand %p3246_p10, %p4444_p7 }
 0x141   : > { %s2496_s25 = sshll.u32 %s4442_s0, 5  ;;  %s3432_s0 = smov [#allocation18]  }
 0x142   : > { %s4232_s10 = sadd.s32 %s2496_s25, %s2495_s14  ;;  %p3248_p5 = pneg %p3247_p1 }
 0x143   : > { %s4380_s9 = sshll.u32 %s4232_s10, 7  ;;  %s3249_s14 = sshll.u32 %s3432_s0, 4  ;;  %s3250_s14 = int_to_ptr.vmem [resolvable:$false] %s3249_s14 }
 0x144   : > { %s3251_s25 = scalar_lea.vmem %s3250_s14, 2048  ;;  %p3252_p2 = scmp.lt.s32.totalorder %s4243_s30, %s3250_s14 }
 0x145   : > { %p3253_p12 = scmp.lt.s32.totalorder %s3251_s25, %s3245_s3 }
 0x146   : > { %2581 = vmatmul.mubr.msk.bf16.vlgmr.msra.gmra.mrb[8].mxu1 %vm543_vm0, %v638_v16 }
 0x147   : > { %2585 = vmatpush3.bf16.msra.mxu1 %v2989_v0  ;;  %2586 = vmatprep.mubr.msk.bf16.mxu1 %vm3431_vm1, %v3430_v10  ;;  %v3947_v0 = vadd.s32 4294967288, %v758_v46  ;;  %vm1050_vm1 = vcmask 64512   ;;  %p3254_p6 = por %p3253_p12, %p3252_p2 }
 0x148   : > { %2782 = vmatprep.subr.msk.bf16.mxu1 %vm1040_vm2, %v1034_v20  ;;  %v782_v20 = vand.u32 15, %v3944_v63 }
 0x149   : > { %v845_v26 = vand.u32 15, %v3947_v0  ;;  %p3255_p8 = pnand %p3254_p6, %p3248_p5 }
 0x14a   : > { %vm4022_vm14 = vcmp.ne.s32.totalorder %v782_v20, 15 }
 0x14b   : > { %vm4034_vm15 = vcmp.ne.s32.totalorder %v845_v26, 0 }
 0x14e   : > { %2587 = vmatmul.mubr.msk.bf16.vlgmr.msra.gmra.mrb[12].mxu1 %vm543_vm0, %v688_v19 }
 0x14f   : > { %2591 = vmatpush3.bf16.msra.mxu1 %v1065_v21  ;;  %v3980_v21 = vstv %s743_s16  ;;  %s4240_s16 = scalar_lea.hbm %s4443_s12, %s4380_s9 }
 0x150   : > { %2783 = vmatprep.subr.msk.bf16.mxu1 %vm1040_vm2, %v3907_v25 }
 0x209   : > { %v2572_v47 = vpop.f32.mrb[0].mxu1 }
 0x20a   : > { %v599_v51 = vadd.f32 %v2572_v47, %v3922_v38  ;;  %v590_v52 = vpop.f32.mrb[1].mxu1 }
 0x20b   : > { %v2573_v58 = vpop.f32.mrb[2].mxu1  ;;  %v591_v6 = vadd.f32 %v3922_v38, %v590_v52 }
 0x20c   : > { %v623_v60 = vmax.f32 %v599_v51, 0.0  ;;  %v602_v61 = vadd.f32 %v2573_v58, %v3922_v38  ;;  %v593_v62 = vpop.f32.mrb[3].mxu1 }
 0x20d   : > { %v594_v2 = vadd.f32 %v3922_v38, %v593_v62  ;;  %v3986_v33 = vmax.f32 %v591_v6, 0.0 }
 0x20e   : > { %v624_v14 = vmax.f32 %v602_v61, 0.0  ;;  %v1017_v19 = vsel %vm3937_vm3, %v623_v60, 0.0  ;;  %vm4058_vm3 = vcmp.ne.s32.totalorder %v852_v32, 15 }
 0x20f   : > { %v622_v15 = vmax.f32 %v594_v2, 0.0 }
 0x210   : > { %v963_v37 = vsel %vm3949_vm4, %v624_v14, 0.0 }
 0x211   : > { %v917_v28 = vpack.c.bf16 %v623_v60, %v622_v15  ;;  %v961_v29 = vsel %vm3954_vm5, %v622_v15, 0.0  ;;  %v1027_v30 = vpack.c.bf16 %v1017_v19, %v622_v15  ;;  %v2576_v31 = vpop.f32.mrb[4].mxu1 }
 0x212   : > { %v972_v27 = vpack.c.bf16 %v623_v60, %v961_v29  ;;  %v615_v34 = vadd.f32 %v2576_v31, %v3922_v38  ;;  %v606_v35 = vpop.f32.mrb[5].mxu1 }
 0x213   : > { %v1278_v39 = vshrl.u32 %v1027_v30, 16  ;;  %v1281_v40 = vshll.u32 %v1027_v30, 16  ;;  %v607_v41 = vadd.f32 %v3922_v38, %v606_v35  ;;  %v2577_v42 = vpop.f32.mrb[6].mxu1  ;;  %v4002_v52 = vrot.slane %v917_v28, 4 }
 0x214   : > { %v1151_v43 = vshrl.u32 %v972_v27, 16  ;;  %v1154_v44 = vshll.u32 %v972_v27, 16  ;;  %v627_v45 = vmax.f32 %v615_v34, 0.0  ;;  %v618_v46 = vadd.f32 %v2577_v42, %v3922_v38  ;;  %v609_v47 = vpop.f32.mrb[7].mxu1 }
 0x215   : > { %v1280_v48 = vrot.slane %v1278_v39, 4  ;;  %v1283_v49 = vrot.slane %v1281_v40, 5  ;;  %v625_v50 = vmax.f32 %v607_v41, 0.0  ;;  %v610_v24 = vadd.f32 %v3922_v38, %v609_v47 }
 0x216   : > { %v1153_v53 = vrot.slane %v1151_v43, 3  ;;  %v1156_v54 = vrot.slane %v1154_v44, 4  ;;  %v1021_v55 = vsel %vm3961_vm6, %v627_v45, 0.0  ;;  %v4008_v62 = vmax.f32 %v618_v46, 0.0 }
 0x217   : > { %v918_v56 = vpack.c.bf16 %v625_v50, %v624_v14  ;;  %v973_v58 = vpack.c.bf16 %v625_v50, %v963_v37  ;;  %v1019_v59 = vsel %vm3965_vm7, %v625_v50, 0.0  ;;  %v626_v60 = vmax.f32 %v610_v24, 0.0 }
 0x218   : > { %v1028_v61 = vpack.c.bf16 %v1019_v59, %v624_v14  ;;  %v4018_v1 = vor.u32 %v1283_v49, %v1280_v48  ;;  %v4020_v2 = vor.u32 %v1156_v54, %v1153_v53  ;;  %v967_v32 = vsel %vm4010_vm12, %v4008_v62, 0.0 }
 0x219   : > { %v1046_v3 = vrot.slane %v918_v56, 4  ;;  %v1160_v6 = vshrl.u32 %v973_v58, 16  ;;  %v1163_v7 = vshll.u32 %v973_v58, 16  ;;  %v919_v11 = vpack.c.bf16 %v627_v45, %v626_v60  ;;  %v676_v15 = vpop.f32.mrb[8].mxu1 }
 0x21a   : > { %v1287_v12 = vshrl.u32 %v1028_v61, 16  ;;  %v1290_v19 = vshll.u32 %v1028_v61, 16  ;;  %v965_v18 = vsel %vm3970_vm8, %v626_v60, 0.0  ;;  %v1029_v28 = vpack.c.bf16 %v1021_v55, %v626_v60  ;;  %v2582_v29 = vpop.f32.mrb[9].mxu1 }
 0x21b   : > { %v1162_v30 = vrot.slane %v1160_v6, 3  ;;  %v1165_v31 = vrot.slane %v1163_v7, 4  ;;  %v974_v27 = vpack.c.bf16 %v627_v45, %v965_v18  ;;  %v4028_v34 = vrot.slane %v919_v11, 4  ;;  %v679_v35 = vpop.f32.mrb[10].mxu1 }
 0x21c   : > { %v1289_v37 = vrot.slane %v1287_v12, 4  ;;  %v1292_v39 = vrot.slane %v1290_v19, 5  ;;  %v1296_v40 = vshrl.u32 %v1029_v28, 16  ;;  %v1299_v20 = vshll.u32 %v1029_v28, 16  ;;  %v2583_v41 = vpop.f32.mrb[11].mxu1 }
 0x21d   : > { %v1166_v42 = vor.u32 %v1165_v31, %v1162_v30  ;;  %v1169_v43 = vshrl.u32 %v974_v27, 16  ;;  %v1172_v44 = vshll.u32 %v974_v27, 16  ;;  %v677_v46 = vadd.f32 %v3922_v38, %v676_v15 }
 0x21e   : > { %v1298_v16 = vrot.slane %v1296_v40, 4  ;;  %v1301_v47 = vrot.slane %v1299_v20, 5  ;;  %v680_v48 = vadd.f32 %v3922_v38, %v679_v35  ;;  %v4040_v49 = vsel %vm1040_vm2, %v4002_v52, %v1046_v3 }
 0x21f   : > { %v1171_v50 = vrot.slane %v1169_v43, 3  ;;  %v1174_v24 = vrot.slane %v1172_v44, 4  ;;  %v683_v53 = vmax.f32 %v677_v46, 0.0  ;;  %v4044_v54 = vsel %vm1040_vm2, %v1046_v3, %v4028_v34 }
 0x220   : > { %v4046_v55 = vor.u32 %v1301_v47, %v1298_v16  ;;  %v684_v56 = vmax.f32 %v680_v48, 0.0  ;;  %v4050_v0 = vsel %vm1132_vm9, %v4020_v2, %v1166_v42  ;;  %v1293_v26 = vor.u32 %v1292_v39, %v1289_v37 }
 0x221   : > { %v1015_v58 = vsel %vm3998_vm10, %v3986_v33, 0.0  ;;  %v739_v59 = vmul.f32 %v3974_v17, %v683_v53  ;;  %v726_v60 = vpop.f32.mrb[12].mxu1  ;;  %v1190_v3 = vsel %vm1040_vm2, %v3907_v25, 0  ;;  %v4064_v6 = vor.u32 %v1174_v24, %v1171_v50 }
 0x222   : > { %v740_v7 = vmul.f32 %v3974_v17, %v684_v56  ;;  %v727_v11 = vadd.f32 %v3922_v38, %v726_v60  ;;  %v2588_v51 = vpop.f32.mrb[13].mxu1  ;;  %v4070_v15 = vsel %vm1259_vm11, %v4018_v1, %v1293_v26  ;;  %v4074_v5 = vsel %vm1259_vm11, %v1293_v26, %v4046_v55 }
 0x223   : > { %v915_v25 = vpack.c.bf16 %v739_v59, %v3430_v10  ;;  %v1013_v17 = vsel %vm4014_vm13, %v739_v59, 0.0  ;;  %v729_v12 = vpop.f32.mrb[14].mxu1  ;;  %v4084_v19 = vsel %vm1132_vm9, %v1166_v42, %v4064_v6 }
 0x224   : > { %v1025_v18 = vpack.c.bf16 %v1013_v17, %v3430_v10  ;;  %v916_v28 = vpack.c.bf16 %v3986_v33, %v740_v7  ;;  %v959_v29 = vsel %vm4022_vm14, %v740_v7, 0.0  ;;  %v1026_v30 = vpack.c.bf16 %v1015_v58, %v740_v7  ;;  %v2589_v57 = vpop.f32.mrb[15].mxu1 }
 0x225   : > { %v1134_v31 = vshrl.u32 %v915_v25, 16  ;;  %v1137_v27 = vshll.u32 %v915_v25, 16  ;;  %v971_v35 = vpack.c.bf16 %v3986_v33, %v959_v29  ;;  %v733_v63 = vmax.f32 %v727_v11, 0.0  ;;  %v1483_v57 = vld [vmem:[#allocation8 + $0x10] sm:$0xf] }
 0x226   : > { %v730_v37 = vadd.f32 %v3922_v38, %v729_v12  ;;  %v1041_v39 = vrot.slane %v915_v25, 4  ;;  %v1042_v40 = vrot.slane %v916_v28, 4  ;;  %v1261_v20 = vshrl.u32 %v1025_v18, 16 }
 0x227   : > { %v745_v41 = vmul.f32 %v3980_v21, %v733_v63  ;;  %v1264_v42 = vshll.u32 %v1025_v18, 16  ;;  %v1269_v43 = vshrl.u32 %v1026_v30, 16  ;;  %v1272_v44 = vshll.u32 %v1026_v30, 16 }
 0x228   : > { %v734_v46 = vmax.f32 %v730_v37, 0.0  ;;  %v1043_v14 = vsel %vm1040_vm2, %v1041_v39, %v1042_v40  ;;  %v4096_v16 = vsel %vm1040_vm2, %v1042_v40, %v4002_v52  ;;  %v1263_v47 = vrot.slane %v1261_v20, 4 }
 0x229   : > { %v920_v33 = vpack.c.bf16 %v745_v41, %v4008_v62  ;;  %v975_v48 = vpack.c.bf16 %v745_v41, %v967_v32  ;;  %v1023_v38 = vsel %vm4034_vm15, %v745_v41, 0.0  ;;  %2592 = vmatprep.mubr.msk.bf16.mxu1 %vm1050_vm1, %v1043_v14  ;;  %v1266_v50 = vrot.slane %v1264_v42, 5 }
 0x22a   : > { %v1030_v24 = vpack.c.bf16 %v1023_v38, %v4008_v62  ;;  %v746_v53 = vmul.f32 %v3980_v21, %v734_v46  ;;  %2593 = vmatmul.mubr.msk.bf16.vlgmr.msra.gmra.mrb[16].mxu1 %vm1050_vm1, %v4096_v16  ;;  %v1271_v56 = vrot.slane %v1269_v43, 4  ;;  %v1274_v52 = vrot.slane %v1272_v44, 5 }
 0x22b   : > { %v1395_v26 = vshrl.u32 %v975_v48, 16  ;;  %v1398_v58 = vshll.u32 %v975_v48, 16  ;;  %2596 = vmatprep.mubr.msk.bf16.mxu1 %vm1050_vm1, %v4040_v49  ;;  %v1267_v59 = vor.u32 %v1266_v50, %v1263_v47  ;;  %v1142_v45 = vshrl.u32 %v971_v35, 16  ;;  %2601 = vmatpush3.bf16.msra.mxu1 %v1190_v3 }
 0x22c   : > { %v921_v60 = vpack.c.bf16 %v3430_v10, %v746_v53  ;;  %v969_v62 = vsel %vm4058_vm3, %v746_v53, 0.0  ;;  %v1275_v7 = vor.u32 %v1274_v52, %v1271_v56  ;;  %v1145_v21 = vshll.u32 %v971_v35, 16  ;;  %2785 = vmatprep.subr.msk.bf16.mxu1 %vm1040_vm2, %v3894_v22  ;;  %v1747_v53 = vld [vmem:[#allocation8 + $0x1c] sm:$0xf]  ;;  %v1831_v52 = vld [vmem:[#allocation8 + $0x20] sm:$0xf] }
 0x22d   : > { %v976_v11 = vpack.c.bf16 %v3430_v10, %v969_v62  ;;  %v1144_v51 = vrot.slane %v1142_v45, 3  ;;  %v1136_v32 = vrot.slane %v1134_v31, 3  ;;  %v1139_v25 = vrot.slane %v1137_v27, 4 }
 0x22e   : > { %v1833_v17 = vshrl.u32 %v921_v60, 16  ;;  %v1836_v12 = vshll.u32 %v921_v60, 16  ;;  %v1276_v18 = vsel %vm1259_vm11, %v1267_v59, %v1275_v7  ;;  %v1285_v3 = vsel %vm1259_vm11, %v1275_v7, %v4018_v1 }
 0x22f   : > { %v1659_v28 = vshrl.u32 %v976_v11, 16  ;;  %v1662_v61 = vshll.u32 %v976_v11, 16  ;;  %2612 = vmatprep.mubr.msk.bf16.mxu0 %vm1050_vm1, %v1276_v18  ;;  %v1147_v29 = vrot.slane %v1145_v21, 4  ;;  %v1140_v30 = vor.u32 %v1139_v25, %v1136_v32  ;;  %v2481_v21 = vld [vmem:[#allocation10] ss:$0 sm:$0xff] }
 0x230   : > { %2613 = vmatmul.mubr.msk.bf16.vlgmr.msra.gmra.mrb[0].mxu0 %vm1050_vm1, %v1285_v3  ;;  %v1397_v10 = vrot.slane %v1395_v26, 3  ;;  %v1400_v22 = vrot.slane %v1398_v58, 4  ;;  %v1485_v31 = vrot.slane %v920_v33, 4  ;;  %v1569_v27 = vshrl.u32 %v1030_v24, 16 }
 0x231   : > { %v1661_v35 = vrot.slane %v1659_v28, 3  ;;  %v1664_v63 = vrot.slane %v1662_v61, 4  ;;  %2621 = vmatpush3.bf16.msra.mxu0 %v3991_v36  ;;  %v1148_v37 = vor.u32 %v1147_v29, %v1144_v51  ;;  %v1572_v39 = vshll.u32 %v1030_v24, 16 }
 0x232   : > { %2597 = vmatmul.mubr.msk.bf16.gmra.mrb[20].mxu1 %vm1050_vm1, %v4044_v54  ;;  %2787 = vmatprep.subr.msk.bf16.mxu0 %vm1040_vm2, %v1483_v57  ;;  %v1401_v1 = vor.u32 %v1400_v22, %v1397_v10  ;;  %v1486_v40 = vsel %vm1040_vm2, %v4028_v34, %v1485_v31  ;;  %v1571_v20 = vrot.slane %v1569_v27, 4  ;;  %v1749_v41 = vrot.slane %v921_v60, 4 }
 0x233   : > { %v1158_v42 = vsel %vm1132_vm9, %v1148_v37, %v4020_v2  ;;  %v1149_v43 = vsel %vm1132_vm9, %v1140_v30, %v1148_v37  ;;  %v1574_v44 = vrot.slane %v1572_v39, 5  ;;  %v1665_v36 = vor.u32 %v1664_v63, %v1661_v35 }
 0x234   : > { %2622 = vmatprep.mubr.msk.bf16.mxu0 %vm1050_vm1, %v1158_v42  ;;  %2602 = vmatprep.mubr.msk.bf16.mxu1 %vm1050_vm1, %v1149_v43  ;;  %v1402_v46 = vsel %vm1132_vm9, %v4064_v6, %v1401_v1  ;;  %v1750_v14 = vsel %vm1040_vm2, %v1485_v31, %v1749_v41  ;;  %v1835_v47 = vrot.slane %v1833_v17, 4  ;;  %v1838_v34 = vrot.slane %v1836_v12, 5  ;;  %v1567_v6 = vld [vmem:[#allocation8 + $0x14] sm:$0xf] }
 0x235   : > { %v1575_v33 = vor.u32 %v1574_v44, %v1571_v20  ;;  %v1666_v48 = vsel %vm1132_vm9, %v1401_v1, %v1665_v36  ;;  %v1491_v24 = vsel %vm1040_vm2, %v1483_v57, 0  ;;  %v1755_v56 = vsel %vm1040_vm2, %v1747_v53, 0 }
 0x236   : > { %v1839_v38 = vor.u32 %v1838_v34, %v1835_v47  ;;  %v1845_v26 = vsel %vm1040_vm2, %v1831_v52, 0 }
 0x237   : > { %v1576_v2 = vsel %vm1259_vm11, %v4046_v55, %v1575_v33  ;;  %v1657_v55 = vld [vmem:[#allocation8 + $0x18] sm:$0xf] }
 0x238   : > { %v1840_v50 = vsel %vm1259_vm11, %v1575_v33, %v1839_v38 }
 0x23a   : > { %2603 = vmatmul.mubr.msk.bf16.vlgmr.msra.gmra.mrb[16].mxu1 %vm1050_vm1, %v1158_v42 }
 0x23b   : > { %2606 = vmatprep.mubr.msk.bf16.mxu1 %vm1050_vm1, %v4050_v0  ;;  %2701 = vmatpush3.bf16.msra.mxu1 %v3900_v23  ;;  %v1581_v23 = vsel %vm1040_vm2, %v1567_v6, 0 }
 0x23c   : > { %2623 = vmatmul.mubr.msk.bf16.vlgmr.msra.gmra.mrb[0].mxu0 %vm1050_vm1, %v4050_v0 }
 0x23d   : > { %2626 = vmatprep.mubr.msk.bf16.mxu0 %vm1050_vm1, %v4084_v19  ;;  %2631 = vmatpush3.bf16.msra.mxu0 %v1491_v24 }
 0x23e   : > { %2788 = vmatprep.subr.msk.bf16.mxu0 %vm1040_vm2, %v1567_v6 }
 0x242   : > { %2607 = vmatmul.mubr.msk.bf16.gmra.mrb[20].mxu1 %vm1050_vm1, %v4084_v19 }
 0x243   : > { %2616 = vmatprep.mubr.msk.bf16.mxu1 %vm1050_vm1, %v4070_v15 }
 0x244   : > { %2627 = vmatmul.mubr.msk.bf16.gmra.mrb[4].mxu0 %vm1050_vm1, %v1402_v46 }
 0x245   : > { %2632 = vmatprep.mubr.msk.bf16.mxu0 %vm1050_vm1, %v4096_v16  ;;  %v1671_v16 = vsel %vm1040_vm2, %v1657_v55, 0 }
 0x24c   : > { %2633 = vmatmul.mubr.msk.bf16.vlgmr.msra.gmra.mrb[0].mxu0 %vm1050_vm1, %v4040_v49 }
 0x24d   : > { %2636 = vmatprep.mubr.msk.bf16.mxu0 %vm1050_vm1, %v4044_v54  ;;  %2641 = vmatpush3.bf16.msra.mxu0 %v1581_v23 }
 0x24e   : > { %2617 = vmatmul.mubr.msk.bf16.vlgmr.msra.gmra.mrb[20].mxu1 %vm1050_vm1, %v4074_v5  ;;  %2789 = vmatprep.subr.msk.bf16.mxu0 %vm1040_vm2, %v1657_v55 }
 0x254   : > { %2637 = vmatmul.mubr.msk.bf16.gmra.mrb[4].mxu0 %vm1050_vm1, %v1486_v40 }
 0x255   : > { %2642 = vmatprep.mubr.msk.bf16.mxu0 %vm1050_vm1, %v1285_v3 }
 0x25c   : > { %2643 = vmatmul.mubr.msk.bf16.vlgmr.msra.gmra.mrb[0].mxu0 %vm1050_vm1, %v4070_v15 }
 0x25d   : > { %2646 = vmatprep.mubr.msk.bf16.mxu0 %vm1050_vm1, %v4074_v5  ;;  %2651 = vmatpush3.bf16.msra.mxu0 %v1671_v16 }
 0x25e   : > { %2790 = vmatprep.subr.msk.bf16.mxu0 %vm1040_vm2, %v1747_v53 }
 0x264   : > { %2647 = vmatmul.mubr.msk.bf16.gmra.mrb[4].mxu0 %vm1050_vm1, %v1576_v2 }
 0x265   : > { %2652 = vmatprep.mubr.msk.bf16.mxu0 %vm1050_vm1, %v4050_v0  ;;  %v2990_v0 = vld [vmem:[#allocation14] sm:$0xff]  }
 0x26c   : > { %2653 = vmatmul.mubr.msk.bf16.vlgmr.msra.gmra.mrb[0].mxu0 %vm1050_vm1, %v4084_v19 }
 0x26d   : > { %2656 = vmatprep.mubr.msk.bf16.mxu0 %vm1050_vm1, %v1402_v46  ;;  %2661 = vmatpush3.bf16.msra.mxu0 %v1755_v56 }
 0x26e   : > { %2791 = vmatprep.subr.msk.bf16.mxu0 %vm1040_vm2, %v1831_v52 }
 0x274   : > { %2657 = vmatmul.mubr.msk.bf16.gmra.mrb[4].mxu0 %vm1050_vm1, %v1666_v48 }
 0x275   : > { %2662 = vmatprep.mubr.msk.bf16.mxu0 %vm1050_vm1, %v4040_v49  ;;  %v1955_v49 = vld [vmem:[#allocation11] sm:$0xf] }
 0x276   : > { %2792 = vmatprep.subr.msk.bf16.mxu1 %vm1040_vm2, %v1955_v49 }
 0x27c   : > { %2663 = vmatmul.mubr.msk.bf16.vlgmr.msra.gmra.mrb[0].mxu0 %vm1050_vm1, %v4044_v54  ;;  %v1976_v54 = vsel %vm1040_vm2, %v1955_v49, 0 }
 0x27d   : > { %2666 = vmatprep.mubr.msk.bf16.mxu0 %vm1050_vm1, %v1486_v40  ;;  %2671 = vmatpush3.bf16.msra.mxu0 %v1845_v26 }
 0x27e   : > { %2681 = vmatpush3.bf16.msra.mxu1 %v1976_v54 }
 0x27f   : > { %2690 = vmatprep.subr.bf16.mxu1 %v2990_v0 }
 0x284   : > { %2667 = vmatmul.mubr.msk.bf16.gmra.mrb[4].mxu0 %vm1050_vm1, %v1750_v14 }
 0x285   : > { %2672 = vmatprep.mubr.msk.bf16.mxu0 %vm1050_vm1, %v4070_v15 }
 0x28c   : > { %2673 = vmatmul.mubr.msk.bf16.vlgmr.msra.gmra.mrb[0].mxu0 %vm1050_vm1, %v4074_v5 }
 0x28d   : > { %2676 = vmatprep.mubr.msk.bf16.mxu0 %vm1050_vm1, %v1576_v2 }
 0x294   : > { %2677 = vmatmul.mubr.msk.bf16.gmra.mrb[4].mxu0 %vm1050_vm1, %v1840_v50 }
 0x30d   : > { %v2604_v19 = vpop.f32.mrb[16].mxu1 }
 0x30e   : > { %v1226_v58 = vpop.f32.mrb[17].mxu1 }
 0x30f   : > { %v2605_v59 = vpop.f32.mrb[18].mxu1 }
 0x310   : > { %v1229_v15 = vpop.f32.mrb[19].mxu1 }
 0x321   : > { %v2618_v45 = vpop.f32.mrb[20].mxu1 }
 0x322   : > { %v1369_v60 = vpop.f32.mrb[21].mxu1 }
 0x323   : > { %v2619_v5 = vpop.f32.mrb[22].mxu1 }
 0x324   : > { %v1372_v62 = vpop.f32.mrb[23].mxu1 }
 0x35f   : > { %v2674_v7 = vpop.f32.mrb[0].mxu0 }
 0x360   : > { %v2702_v11 = vadd.f32 %v2674_v7, %v2604_v19  ;;  %v1881_v51 = vpop.f32.mrb[1].mxu0 }
 0x361   : > { %v2703_v32 = vadd.f32 %v1881_v51, %v1226_v58  ;;  %v2675_v25 = vpop.f32.mrb[2].mxu0 }
 0x362   : > { %v1929_v17 = vadd.f32 %v2702_v11, %v2481_v21  ;;  %v2704_v12 = vadd.f32 %v2675_v25, %v2605_v59  ;;  %v1884_v18 = vpop.f32.mrb[3].mxu0 }
 0x363   : > { %v1927_v3 = vadd.f32 %v2703_v32, %v2481_v21  ;;  %v2705_v28 = vadd.f32 %v1884_v18, %v1229_v15 }
 0x364   : > { %v1937_v61 = vmax.f32 %v1929_v17, 0.0  ;;  %v1930_v29 = vadd.f32 %v2704_v12, %v2481_v21 }
 0x365   : > { %v1935_v30 = vmax.f32 %v1927_v3, 0.0  ;;  %v1928_v57 = vadd.f32 %v2705_v28, %v2481_v21 }
 0x366   : > { %1945 = vst.msk [vmem:[%s4200_s28 + $0x10] sm:$0xff] %vm1050_vm1, %v1937_v61  ;;  %v1938_v10 = vmax.f32 %v1930_v29, 0.0 }
 0x367   : > { %1943 = vst.msk [vmem:[%s4200_s28] sm:$0xff] %vm1050_vm1, %v1935_v30  ;;  %v1936_v22 = vmax.f32 %v1928_v57, 0.0  ;;  %v2678_v31 = vpop.f32.mrb[4].mxu0 }
 0x368   : > { %1946 = vst.msk [vmem:[%s4200_s28 + $0x18] sm:$0xff] %vm1050_vm1, %v1938_v10  ;;  %v1952_v27 = vpack.c.bf16 %v1938_v10, %v1937_v61  ;;  %v2706_v35 = vadd.f32 %v2678_v31, %v2618_v45  ;;  %v1897_v63 = vpop.f32.mrb[5].mxu0 }
 0x369   : > { %1944 = vst.msk [vmem:[%s4200_s28 + $0x8] sm:$0xff] %vm1050_vm1, %v1936_v22  ;;  %v1951_v37 = vpack.c.bf16 %v1936_v22, %v1935_v30  ;;  %v2707_v39 = vadd.f32 %v1897_v63, %v1369_v60  ;;  %v2679_v1 = vpop.f32.mrb[6].mxu0 }
 0x36a   : > { %v1933_v40 = vadd.f32 %v2706_v35, %v2481_v21  ;;  %v2708_v20 = vadd.f32 %v2679_v1, %v2619_v5  ;;  %v1900_v41 = vpop.f32.mrb[7].mxu0 }
 0x36b   : > { %v1931_v42 = vadd.f32 %v2707_v39, %v2481_v21  ;;  %v2709_v43 = vadd.f32 %v1900_v41, %v1372_v62  ;;  %2682 = vmatprep.mubr.msk.bf16.mxu1 %vm1050_vm1, %v1951_v37 }
 0x36c   : > { %v1941_v44 = vmax.f32 %v1933_v40, 0.0  ;;  %v1934_v36 = vadd.f32 %v2708_v20, %v2481_v21  ;;  %2683 = vmatmul.mubr.msk.bf16.vlgmr.msra.gmra.mrb[24].mxu1 %vm1050_vm1, %v1952_v27 }
 0x36d   : > { %v1939_v46 = vmax.f32 %v1931_v42, 0.0  ;;  %v1932_v14 = vadd.f32 %v2709_v43, %v2481_v21  ;;  %2691 = vmatpush3.bf16.msra.mxu1 %v2990_v0 }
 0x36e   : > { %1949 = vst.msk [vmem:[%s4200_s28 + $0x30] sm:$0xff] %vm1050_vm1, %v1941_v44  ;;  %v1942_v47 = vmax.f32 %v1934_v36, 0.0 }
 0x36f   : > { %1947 = vst.msk [vmem:[%s4200_s28 + $0x20] sm:$0xff] %vm1050_vm1, %v1939_v46  ;;  %v1940_v34 = vmax.f32 %v1932_v14, 0.0 }
 0x370   : > { %1950 = vst.msk [vmem:[%s4200_s28 + $0x38] sm:$0xff] %vm1050_vm1, %v1942_v47  ;;  %v1954_v33 = vpack.c.bf16 %v1942_v47, %v1941_v44 }
 0x371   : > { %1948 = vst.msk [vmem:[%s4200_s28 + $0x28] sm:$0xff] %vm1050_vm1, %v1940_v34  ;;  %v1953_v48 = vpack.c.bf16 %v1940_v34, %v1939_v46 }
 0x373   : > { %2686 = vmatprep.mubr.msk.bf16.mxu1 %vm1050_vm1, %v1953_v48 }
 0x374   : > { %2687 = vmatmul.mubr.msk.bf16.gmra.mrb[28].mxu1 %vm1050_vm1, %v1954_v33 }
 0x375   : > { %2692 = vmatprep.mubr.msk.bf16.mxu1 %vm543_vm0, %v3867_v4 }
 0x37c   : > { %2693 = vmatmul.mubr.msk.bf16.vlgmr.msra.gmra.mrb[24].mxu1 %vm543_vm0, %v3869_v8 }
 0x37d   : > { %2696 = vmatprep.mubr.msk.bf16.mxu1 %vm543_vm0, %v3871_v9 }
 0x384   : > { %2697 = vmatmul.mubr.msk.bf16.gmra.mrb[28].mxu1 %vm543_vm0, %v3882_v13 }
 0x385   : > { %3258 = shalt.err (!%p3255_p8)
}
 0x386   : > { %s3259_s28 = scalar_lea.hbm %s4240_s16, 1024  ;;  %s3263_s0 = scalar_lea.hbm %s4443_s12, 8192 }
 0x387   : > { %p3260_p13 = scmp.ne.s32.totalorder %s4240_s16, %s3259_s28  ;;  %p3264_p3 = scmp.lt.u32.totalorder %s4240_s16, %s4443_s12 }
 0x388   : > { %p3265_p11 = scmp.lt.u32.totalorder %s3263_s0, %s3259_s28  ;;  %p3267_p10 = scmp.lt.u32.totalorder %s3259_s28, %s4240_s16 }
 0x389   : > { %p3261_p9 = pnand %p3260_p13, %p4444_p7 }
 0x38a   : > { %p3266_p4 = por %p3265_p11, %p3264_p3 }
 0x38b   : > { %p3262_p0 = pneg %p3261_p9 }
 0x38c   : > { %p3268_p1 = por %p3267_p10, %p3266_p4 }
 0x38e   : > { %p3269_p5 = pnand %p3268_p1, %p3262_p0 }
 0x390   : > { %3272 = shalt.err (!%p3269_p5)
}
 0x391   : > { %s4381_s3 = smov 128   ;;  %s3434_s25 = smov 8   ;;  %v2482_v4 = vld [vmem:[#allocation13] ss:$0 sm:$0xff]  ;;  %v2492_v9 = vld [vmem:[#allocation16] ss:$0 sm:$0xff] }
 0x392   : > { %2828 = dma.vmem_to_hbm [thread:$0]  (%p4444_p7), %s4243_s30, 1024, %s4240_s16, %s2162_s20, %s4381_s3, %s4381_s3, %s3434_s25   ;;  %vm2147_vm0 = vcmask 261120  }
 0x393   : > { %s4445_s9 = sshll.u32 %s4195_s2, 6  ;;  %s4446_s30 = sshll.u32 %s4232_s10, 7 }
 0x394   : > { %s503_s20 = scalar_lea.vmem [#allocation17], %s4445_s9  ;;  %s4447_s24 = sld [smem:[#allocation37_spill]] }
 0x395   : > { %s2177_s16 = sshll.u32 %s503_s20, 4  ;;  %s3435_s10 = smov [#allocation17]   ;;  %s4287_s16 = int_to_ptr.vmem [resolvable:$true] %s2177_s16 }
 0x396   : > { %s3273_s9 = scalar_lea.vmem %s4287_s16, 1024  ;;  %s3277_s3 = sshll.u32 %s3435_s10, 4  ;;  %s3278_s3 = int_to_ptr.vmem [resolvable:$false] %s3277_s3 }
 0x397   : > { %p3274_p2 = scmp.ne.s32.totalorder %s4287_s16, %s3273_s9  ;;  %p3280_p8 = scmp.lt.s32.totalorder %s4287_s16, %s3278_s3 }
 0x399   : > { %p3275_p12 = pnand %p3274_p2, %p4444_p7 }
 0x39a   : > { %s4285_s0 = scalar_lea.hbm %s4447_s24, %s4446_s30  ;;  %s3279_s30 = scalar_lea.vmem %s3278_s3, 2048 }
 0x39b   : > { %p3276_p6 = pneg %p3275_p12  ;;  %p3281_p13 = scmp.lt.s32.totalorder %s3279_s30, %s3273_s9 }
 0x39d   : > { %p3282_p9 = por %p3281_p13, %p3280_p8 }
 0x39f   : > { %p3283_p0 = pnand %p3282_p9, %p3276_p6 }
 0x44f   : > { %v2694_v8 = vpop.f32.mrb[24].mxu1 }
 0x450   : > { %v2710_v13 = vadd.f32 %v2694_v8, %v2482_v4  ;;  %v2085_v38 = vpop.f32.mrb[25].mxu1 }
 0x451   : > { %v2711_v2 = vadd.f32 %v2482_v4, %v2085_v38  ;;  %v2695_v50 = vpop.f32.mrb[26].mxu1 }
 0x452   : > { %v2133_v24 = vadd.f32 %v2710_v13, %v2492_v9  ;;  %v2712_v6 = vadd.f32 %v2695_v50, %v2482_v4  ;;  %v2088_v23 = vpop.f32.mrb[27].mxu1 }
 0x453   : > { %v2131_v55 = vadd.f32 %v2711_v2, %v2492_v9  ;;  %v2713_v16 = vadd.f32 %v2482_v4, %v2088_v23 }
 0x454   : > { %v2141_v53 = vmax.f32 %v2133_v24, 0.0  ;;  %v2134_v56 = vadd.f32 %v2712_v6, %v2492_v9 }
 0x455   : > { %v2139_v52 = vmax.f32 %v2131_v55, 0.0  ;;  %v2132_v26 = vadd.f32 %v2713_v16, %v2492_v9 }
 0x456   : > { %2150 = vst.msk [vmem:[%s503_s20 + $0x10] sm:$0xff] %vm2147_vm0, %v2141_v53  ;;  %v2142_v49 = vmax.f32 %v2134_v56, 0.0 }
 0x457   : > { %2148 = vst.msk [vmem:[%s503_s20] sm:$0xff] %vm2147_vm0, %v2139_v52  ;;  %v2140_v54 = vmax.f32 %v2132_v26, 0.0  ;;  %v2698_v0 = vpop.f32.mrb[28].mxu1 }
 0x458   : > { %2151 = vst.msk [vmem:[%s503_s20 + $0x18] sm:$0xff] %vm2147_vm0, %v2142_v49  ;;  %v2714_v19 = vadd.f32 %v2698_v0, %v2482_v4  ;;  %v2101_v58 = vpop.f32.mrb[29].mxu1 }
 0x459   : > { %2149 = vst.msk [vmem:[%s503_s20 + $0x8] sm:$0xff] %vm2147_vm0, %v2140_v54  ;;  %v2715_v59 = vadd.f32 %v2482_v4, %v2101_v58  ;;  %v2699_v15 = vpop.f32.mrb[30].mxu1 }
 0x45a   : > { %v2137_v45 = vadd.f32 %v2714_v19, %v2492_v9  ;;  %v2716_v60 = vadd.f32 %v2699_v15, %v2482_v4  ;;  %v2104_v5 = vpop.f32.mrb[31].mxu1 }
 0x45b   : > { %v2135_v62 = vadd.f32 %v2715_v59, %v2492_v9  ;;  %v2717_v7 = vadd.f32 %v2482_v4, %v2104_v5 }
 0x45c   : > { %v2145_v21 = vmax.f32 %v2137_v45, 0.0  ;;  %v2138_v11 = vadd.f32 %v2716_v60, %v2492_v9 }
 0x45d   : > { %v2143_v51 = vmax.f32 %v2135_v62, 0.0  ;;  %v2136_v32 = vadd.f32 %v2717_v7, %v2492_v9 }
 0x45e   : > { %2154 = vst.msk [vmem:[%s503_s20 + $0x30] sm:$0xff] %vm2147_vm0, %v2145_v21  ;;  %v2146_v25 = vmax.f32 %v2138_v11, 0.0 }
 0x45f   : > { %2152 = vst.msk [vmem:[%s503_s20 + $0x20] sm:$0xff] %vm2147_vm0, %v2143_v51  ;;  %v2144_v17 = vmax.f32 %v2136_v32, 0.0 }
 0x460   : > { %2155 = vst.msk [vmem:[%s503_s20 + $0x38] sm:$0xff] %vm2147_vm0, %v2146_v25 }
 0x461   : > { %2153 = vst.msk [vmem:[%s503_s20 + $0x28] sm:$0xff] %vm2147_vm0, %v2144_v17 }
 0x462   : > { %3286 = shalt.err (!%p3283_p0)
}
 0x463   : > { %s3287_s20 = scalar_lea.hbm %s4285_s0, 1024  ;;  %s3291_s10 = scalar_lea.hbm %s4447_s24, 8192 }
 0x464   : > { %p3288_p3 = scmp.ne.s32.totalorder %s4285_s0, %s3287_s20  ;;  %p3292_p10 = scmp.lt.u32.totalorder %s4285_s0, %s4447_s24 }
 0x465   : > { %p3293_p1 = scmp.lt.u32.totalorder %s3291_s10, %s3287_s20  ;;  %p3295_p2 = scmp.lt.u32.totalorder %s3287_s20, %s4285_s0 }
 0x466   : > { %p3289_p11 = pnand %p3288_p3, %p4444_p7 }
 0x467   : > { %p3294_p5 = por %p3293_p1, %p3292_p10 }
 0x468   : > { %p3290_p4 = pneg %p3289_p11 }
 0x469   : > { %p3296_p12 = por %p3295_p2, %p3294_p5 }
 0x46b   : > { %p3297_p6 = pnand %p3296_p12, %p3290_p4 }
 0x46d   : > { %3300 = shalt.err (!%p3297_p6)
}
 0x46e   : > { %s4448_s9 = smov 128   ;;  %s4449_s30 = scalar_lea.sflag [#allocation4], %s4195_s2 }
 0x46f   : > { %2827 = dma.vmem_to_hbm [thread:$0]  (%p4444_p7), %s4287_s16, 1024, %s4285_s0, %s4449_s30, %s4448_s9, %s4448_s9, %s3434_s25  }
 0x470 PF: > { %s4450_s14 = sld [smem:[#allocation27_spill]]  ;;  %p2884_p8 = scmp.ge.s32.totalorder %s3415_s23, 2 }
 0x471   : > { %p4451_p13 = scmp.ne.s32.totalorder %s4410_s1, 0 }
 0x473   : > { %p2861_p9 = pnand %p2884_p8, %p4451_p13 }
 0x476   : > { %s2210_s28 = sand.u32 1, %s4450_s14  }
 0x477   : > { %s2211_s20 = scalar_lea.sflag [#allocation4], %s2210_s28 }
 0x478   : > { %3366 = dma.done.wait (!%p2861_p9), %s2211_s20, 1024  }
 0x479   : > { %3368 = vsyncadd (!%p2861_p9), %s2211_s20, 4294966272  ;;  %s2220_s19 = scalar_lea.sflag [#allocation19], %s2210_s28 }
 0x47a   : > { %3370 = dma.done.wait (!%p2861_p9), %s2220_s19, 1024  }
 0x47b   : > { %3372 = vsyncadd (!%p2861_p9), %s2220_s19, 4294966272  ;;  %s34_s23 = sadd.s32 1, %s3415_s23   ;;  %s4452_s2 = sld [smem:[#allocation28_spill]] }
 0x47c   : > { %p31_p0 = scmp.ge.s32.totalorder %s34_s23, 10   ;;  %s4453_s14 = sld [smem:[#allocation29_spill]] }
 0x47d   : > { %s4454_s25 = smov %s3781_s13  ;;  %s4455_s1 = smov %s4470_s15 }
 0x47e   : > { %s4457_s15 = smov %s4472_s26  ;;  %s4458_s16 = smov %s3391_s17 }
 0x47f   : > { %s4459_s17 = smov %s3395_s18  ;;  %s4460_s18 = smov %s4454_s25 }
 0x480   : > { %s4461_s19 = smov %s3407_s21  ;;  %s4462_s20 = smov %s3411_s22 }
 0x481   : > { %s4456_s13 = smov %s4452_s2  ;;  %s4463_s21 = smov %s4466_s29 }
 0x482   : > { %s4464_s22 = smov %s4455_s1  ;;  %33 = sbr.rel (!%p31_p0) target bundleno = 22 (0x16), region = 161 }
 0x489   :  { %2225 = vsyncpa [#allocation3], 1 }
 0x48a   :  { %2227 = vsyncpa [#allocation3 + $0x1], 1 }
 0x48b   :  { %2228 = vsyncpa [#allocation6], 1 }
 0x48c   :  { %2229 = vsyncpa [#allocation9], 1 }
 0x48d   :  { %2230 = vsyncpa [#allocation12], 1 }
 0x48e   :  { %2231 = vsyncpa [#allocation15], 1 }
 0x48f   :  { %2232 = vsyncpa [#allocation4], 1 }
 0x490   :  { %2234 = vsyncpa [#allocation4 + $0x1], 1 }
 0x491   :  { %2235 = vsyncpa [#allocation19], 1 }
 0x492   :  { %2237 = vsyncpa [#allocation19 + $0x1], 1 }

</bundles_post_ra>
